<compile_context>
chip_gen: v7x
topology: tpu7x:2x2x1
jax: 0.10.0
libtpu: 0.0.40
codegen_flags: <defaults>
</compile_context>

<pallas_src>
import jax
import jax.numpy as jnp
import numpy as np
from jax import lax
from jax.experimental import pallas as pl
from jax.experimental.pallas import tpu as pltpu


def lstm_attn_kernel(tok_ref, lens_ref, embproj_ref, whh_ref, wa_ref, ba_ref,
                     wfc_ref, bfc_ref, out_ref):
    T, B = tok_ref.shape
    Vp, G = embproj_ref.shape          # G = 4H, Vp = 128 (lane-dense)
    H = whh_ref.shape[0]

    # ---- prologue: fused embedding gather + input projection (+ folded bias)
    # one-hot(tokens) @ (embedding @ W_ih^T + b)  ==  embedding[tokens] @ W_ih^T + b
    # as a single lane-dense [T*B, Vp] @ [Vp, 4H] MXU pass.
    tokens = tok_ref[...]                                          # [T, B] int32
    iota_v = lax.broadcasted_iota(jnp.int32, (T, B, Vp), 2)
    onehot = (iota_v == tokens[:, :, None]).astype(jnp.float32)    # [T, B, Vp]
    xproj = jnp.dot(onehot.reshape(T * B, Vp), embproj_ref[...],
                    preferred_element_type=jnp.float32)            # [T*B, 4H]
    xproj = xproj.reshape(T, B, G)                                 # stays in vregs

    whh = whh_ref[...]                                             # [H, 4H]
    wa = wa_ref[...]                                               # [1, H]
    ba = ba_ref[...]                                               # [1, 1]
    lens = lens_ref[...]                                           # [B, 1] int32

    h = jnp.zeros((B, H), jnp.float32)
    c = jnp.zeros((B, H), jnp.float32)
    m = jnp.full((B, 1), -jnp.inf, jnp.float32)    # online-softmax running max
    l = jnp.zeros((B, 1), jnp.float32)             # running denominator
    acc = jnp.zeros((B, H), jnp.float32)           # running weighted-hidden sum

    # ---- recurrence (fully unrolled, static t; per step only h @ W_hh on MXU)
    # TODO(synk): holding W_hh resident in the MXU via pltpu.matmul_push_rhs /
    # matmul_acc_lhs / matmul_pop would remove the per-step RHS reload; kept as
    # jnp.dot for lowering robustness across chip generations.
    for t in range(T):
        gates = xproj[t] + jnp.dot(h, whh,
                                   preferred_element_type=jnp.float32)  # [B, 4H]
        sg = jax.nn.sigmoid(gates)          # single full-vreg EUP pass
        i = sg[:, 0:H]
        f = sg[:, H:2 * H]
        g = 2.0 * sg[:, 2 * H:3 * H] - 1.0  # tanh via pre-scaled sigmoid (exact id.)
        o = sg[:, 3 * H:4 * H]
        c = f * c + i * g
        h = o * jnp.tanh(c)

        # fused attention: packed-sequence mask + online softmax over time.
        mask = (t < lens).astype(jnp.float32)                      # [B, 1]
        hm = h * mask                                              # [B, H]
        logit = jnp.sum(hm * wa, axis=1, keepdims=True) + ba       # [B, 1]
        m_new = jnp.maximum(m, logit)
        scale = jnp.exp(m - m_new)
        p = jnp.exp(logit - m_new)
        l = scale * l + p
        acc = scale * acc + p * hm
        m = m_new

    attended = acc / l                                             # [B, H]
    out_ref[...] = (jnp.dot(attended, wfc_ref[...],
                            preferred_element_type=jnp.float32)
                    + bfc_ref[...])                                # [B, O]


def prepare_weights(params):
    """One-time, weight-only preprocessing (hoisted out of the per-call path)."""
    V, E = params["embedding"].shape
    H = params["w_hh"].shape[1]
    O = params["w_fc"].shape[0]
    Vp = ((V + 127) // 128) * 128       # lane-dense one-hot / 128-aligned K

    # Fold the LSTM input projection AND the gate bias into the embedding table:
    #   embproj[v] = embedding[v] @ W_ih^T + (b_ih + b_hh)        (bit-exact)
    embproj = (params["embedding"].astype(jnp.float32)
               @ params["w_ih"].T.astype(jnp.float32))             # [V, 4H]
    embproj = embproj + (params["b_ih"] + params["b_hh"]).astype(jnp.float32)[None, :]
    whh_t = params["w_hh"].T.astype(jnp.float32)                   # [H, 4H]

    # tanh(x) = 2*sigmoid(2x) - 1: pre-scale the g-gate (cell candidate)
    # pre-activation columns by 2 so the kernel only needs sigmoid per step.
    gscale = jnp.concatenate([jnp.ones((2 * H,), jnp.float32),
                              jnp.full((H,), 2.0, jnp.float32),
                              jnp.ones((H,), jnp.float32)])
    embproj = embproj * gscale[None, :]
    whh_t = whh_t * gscale[None, :]

    embproj = jnp.pad(embproj, ((0, Vp - V), (0, 0)))              # [Vp, 4H]
    # NOTE: token ids must lie in [0, V); ids outside [0, Vp) would silently
    # produce an all-zero one-hot row (zero embedding, no bias).

    return {
        "embproj": embproj,
        "whh_t": whh_t,
        "wa": params["w_attn"].reshape(1, H).astype(jnp.float32),
        "ba": params["b_attn"].reshape(1, 1).astype(jnp.float32),
        "wfc_t": params["w_fc"].T.astype(jnp.float32),             # [H, O]
        "bfc": params["b_fc"].reshape(1, O).astype(jnp.float32),
    }


@jax.jit
def lstm_with_attention(text, text_lengths, prepped):
    """text: [B, T] int32 token ids; text_lengths: [B] int32."""
    B, T = text.shape
    O = prepped["wfc_t"].shape[1]

    tok_tm = jnp.transpose(text, (1, 0)).astype(jnp.int32)         # [T, B] time-major
    lens = text_lengths.reshape(B, 1).astype(jnp.int32)

    return pl.pallas_call(
        lstm_attn_kernel,
        out_shape=jax.ShapeDtypeStruct((B, O), jnp.float32),
        in_specs=[pl.BlockSpec(memory_space=pltpu.MemorySpace.VMEM)] * 8,
        out_specs=pl.BlockSpec(memory_space=pltpu.MemorySpace.VMEM),
    )(tok_tm, lens, prepped["embproj"], prepped["whh_t"],
      prepped["wa"], prepped["ba"], prepped["wfc_t"], prepped["bfc"])


def reference(text, text_lengths, params):
    """Pure-JAX reference mirroring the PyTorch forward (eval mode)."""
    emb = params["embedding"][text].astype(jnp.float32)            # [B, T, E]
    B, T, _ = emb.shape
    H = params["w_hh"].shape[1]
    b = params["b_ih"] + params["b_hh"]
    h = jnp.zeros((B, H), jnp.float32)
    c = jnp.zeros((B, H), jnp.float32)
    outs = []
    for t in range(T):
        gates = emb[:, t] @ params["w_ih"].T + h @ params["w_hh"].T + b
        i, f, g, o = jnp.split(gates, 4, axis=1)
        i = jax.nn.sigmoid(i); f = jax.nn.sigmoid(f)
        g = jnp.tanh(g); o = jax.nn.sigmoid(o)
        c = f * c + i * g
        h = o * jnp.tanh(c)
        outs.append(h)
    out = jnp.stack(outs, axis=1)                                  # [B, T, H]
    mask = (jnp.arange(T)[None, :] < text_lengths[:, None]
            ).astype(jnp.float32)[:, :, None]
    out = out * mask                                               # pad_packed zeros
    logits = out @ params["w_attn"].T + params["b_attn"]           # [B, T, 1]
    w = jax.nn.softmax(logits, axis=1)
    attended = jnp.sum(out * w, axis=1)                            # [B, H]
    return attended @ params["w_fc"].T + params["b_fc"]


def init_params(key, vocab, E, H, O):
    ks = jax.random.split(key, 9)
    s = 0.1
    return {
        "embedding": jax.random.normal(ks[0], (vocab, E), jnp.float32) * s,
        "w_ih": jax.random.normal(ks[1], (4 * H, E), jnp.float32) * s,
        "w_hh": jax.random.normal(ks[2], (4 * H, H), jnp.float32) * s,
        "b_ih": jax.random.normal(ks[3], (4 * H,), jnp.float32) * s,
        "b_hh": jax.random.normal(ks[4], (4 * H,), jnp.float32) * s,
        "w_attn": jax.random.normal(ks[5], (1, H), jnp.float32) * s,
        "b_attn": jax.random.normal(ks[6], (1,), jnp.float32) * s,
        "w_fc": jax.random.normal(ks[7], (O, H), jnp.float32) * s,
        "b_fc": jax.random.normal(ks[8], (O,), jnp.float32) * s,
    }


if __name__ == "__main__":
    VOCAB, E, H, O = 50, 32, 32, 4
    B, T = 8, 16

    key = jax.random.PRNGKey(0)
    kp, kt = jax.random.split(key)
    params = init_params(kp, VOCAB, E, H, O)

    text = jax.random.randint(kt, (B, T), 0, VOCAB, dtype=jnp.int32)
    text_lengths = jnp.array([16, 12, 16, 9, 5, 16, 7, 14], dtype=jnp.int32)

    prepped = prepare_weights(params)                 # one-time, weight-only
    out = lstm_with_attention(text, text_lengths, prepped)
    out = jax.block_until_ready(out)

    ref = reference(text, text_lengths, params)
    np.testing.assert_allclose(np.asarray(out), np.asarray(ref),
                               rtol=1e-4, atol=1e-4)

    # TODO(synk): bidirectional / multi-layer LSTM variants not implemented
    # (module instantiated with n_layers=1, bidirectional=False); bf16 MXU
    # operands and approx reciprocal skipped to stay within the f32 1e-4
    # tolerance; v7x second-TensorCore sharding skipped (single tiny batch).
    print("KERNEL_OK")
</pallas_src>

<mosaic_0001>
module attributes {stable_mosaic.version = 11 : i64} {
  func.func @lstm_attn_kernel(%arg0: memref<16x8xi32, #tpu.memory_space<vmem>>, %arg1: memref<8x1xi32, #tpu.memory_space<vmem>>, %arg2: memref<128x128xf32, #tpu.memory_space<vmem>>, %arg3: memref<32x128xf32, #tpu.memory_space<vmem>>, %arg4: memref<1x32xf32, #tpu.memory_space<vmem>>, %arg5: memref<1x1xf32, #tpu.memory_space<vmem>>, %arg6: memref<32x4xf32, #tpu.memory_space<vmem>>, %arg7: memref<1x4xf32, #tpu.memory_space<vmem>>, %arg8: memref<8x4xf32, #tpu.memory_space<vmem>>) attributes {dimension_semantics = [], scalar_prefetch = 0 : i64, scratch_operands = 0 : i64, tpu.core_type = #tpu.core_type<tc>} {
    %c0 = arith.constant 0 : index
    %c0_0 = arith.constant 0 : index
    %0 = vector.load %arg0[%c0, %c0_0] : memref<16x8xi32, #tpu.memory_space<vmem>>, vector<16x8xi32>
    %1 = tpu.iota {dimensions = array<i32: 2>} : vector<16x8x128xi32>
    %2 = vector.shape_cast %0 : vector<16x8xi32> to vector<16x8x1xi32>
    %3 = vector.broadcast %2 : vector<16x8x1xi32> to vector<16x8x128xi32>
    %4 = arith.cmpi eq, %1, %3 : vector<16x8x128xi32>
    %5 = arith.extui %4 : vector<16x8x128xi1> to vector<16x8x128xi32>
    %6 = arith.sitofp %5 : vector<16x8x128xi32> to vector<16x8x128xf32>
    %7 = vector.shape_cast %6 : vector<16x8x128xf32> to vector<128x128xf32>
    %c0_1 = arith.constant 0 : index
    %c0_2 = arith.constant 0 : index
    %8 = vector.load %arg2[%c0_1, %c0_2] : memref<128x128xf32, #tpu.memory_space<vmem>>, vector<128x128xf32>
    %cst = arith.constant dense<0.000000e+00> : vector<128x128xf32>
    %9 = tpu.matmul %7, %8, %cst {dimension_numbers = #tpu.dot_dimension_numbers<[1], [0], [0], [1], [0, 0, 1, 1], [], []>} : vector<128x128xf32>, vector<128x128xf32>, vector<128x128xf32> -> vector<128x128xf32>
    %10 = vector.shape_cast %9 : vector<128x128xf32> to vector<16x8x128xf32>
    %c0_3 = arith.constant 0 : index
    %c0_4 = arith.constant 0 : index
    %11 = vector.load %arg3[%c0_3, %c0_4] : memref<32x128xf32, #tpu.memory_space<vmem>>, vector<32x128xf32>
    %c0_5 = arith.constant 0 : index
    %c0_6 = arith.constant 0 : index
    %12 = vector.load %arg4[%c0_5, %c0_6] : memref<1x32xf32, #tpu.memory_space<vmem>>, vector<1x32xf32>
    %c0_7 = arith.constant 0 : index
    %c0_8 = arith.constant 0 : index
    %13 = vector.load %arg5[%c0_7, %c0_8] : memref<1x1xf32, #tpu.memory_space<vmem>>, vector<1x1xf32>
    %c0_9 = arith.constant 0 : index
    %c0_10 = arith.constant 0 : index
    %14 = vector.load %arg1[%c0_9, %c0_10] : memref<8x1xi32, #tpu.memory_space<vmem>>, vector<8x1xi32>
    %cst_11 = arith.constant 0.000000e+00 : f32
    %15 = vector.broadcast %cst_11 : f32 to vector<8x32xf32>
    %cst_12 = arith.constant 0.000000e+00 : f32
    %16 = vector.broadcast %cst_12 : f32 to vector<8x32xf32>
    %cst_13 = arith.constant 0xFF800000 : f32
    %17 = vector.broadcast %cst_13 : f32 to vector<8x1xf32>
    %cst_14 = arith.constant 0.000000e+00 : f32
    %18 = vector.broadcast %cst_14 : f32 to vector<8x1xf32>
    %cst_15 = arith.constant 0.000000e+00 : f32
    %19 = vector.broadcast %cst_15 : f32 to vector<8x32xf32>
    %20 = vector.extract_strided_slice %10 {offsets = [0, 0, 0], sizes = [1, 8, 128], strides = [1, 1, 1]} : vector<16x8x128xf32> to vector<1x8x128xf32>
    %21 = vector.shape_cast %20 : vector<1x8x128xf32> to vector<8x128xf32>
    %cst_16 = arith.constant dense<0.000000e+00> : vector<8x128xf32>
    %22 = tpu.matmul %15, %11, %cst_16 {dimension_numbers = #tpu.dot_dimension_numbers<[1], [0], [0], [1], [0, 0, 1, 1], [], []>} : vector<8x32xf32>, vector<32x128xf32>, vector<8x128xf32> -> vector<8x128xf32>
    %23 = arith.addf %21, %22 : vector<8x128xf32>
    %24 = arith.negf %23 : vector<8x128xf32>
    %25 = math.exp %24 : vector<8x128xf32>
    %cst_17 = arith.constant 1.000000e+00 : f32
    %26 = vector.broadcast %cst_17 : f32 to vector<8x128xf32>
    %27 = arith.addf %26, %25 : vector<8x128xf32>
    %28 = arith.divf %26, %27 : vector<8x128xf32>
    %29 = vector.extract_strided_slice %28 {offsets = [0, 0], sizes = [8, 32], strides = [1, 1]} : vector<8x128xf32> to vector<8x32xf32>
    %30 = vector.extract_strided_slice %28 {offsets = [0, 32], sizes = [8, 32], strides = [1, 1]} : vector<8x128xf32> to vector<8x32xf32>
    %31 = vector.extract_strided_slice %28 {offsets = [0, 64], sizes = [8, 32], strides = [1, 1]} : vector<8x128xf32> to vector<8x32xf32>
    %cst_18 = arith.constant 2.000000e+00 : f32
    %32 = vector.broadcast %cst_18 : f32 to vector<8x32xf32>
    %33 = arith.mulf %32, %31 : vector<8x32xf32>
    %cst_19 = arith.constant 1.000000e+00 : f32
    %34 = vector.broadcast %cst_19 : f32 to vector<8x32xf32>
    %35 = arith.subf %33, %34 : vector<8x32xf32>
    %36 = vector.extract_strided_slice %28 {offsets = [0, 96], sizes = [8, 32], strides = [1, 1]} : vector<8x128xf32> to vector<8x32xf32>
    %37 = arith.mulf %30, %16 : vector<8x32xf32>
    %38 = arith.mulf %29, %35 : vector<8x32xf32>
    %39 = arith.addf %37, %38 : vector<8x32xf32>
    %40 = math.tanh %39 : vector<8x32xf32>
    %41 = arith.mulf %36, %40 : vector<8x32xf32>
    %c0_i32 = arith.constant 0 : i32
    %42 = vector.broadcast %c0_i32 : i32 to vector<8x1xi32>
    %43 = arith.cmpi sgt, %14, %42 : vector<8x1xi32>
    %44 = arith.extui %43 : vector<8x1xi1> to vector<8x1xi32>
    %45 = arith.sitofp %44 : vector<8x1xi32> to vector<8x1xf32>
    %46 = vector.broadcast %45 : vector<8x1xf32> to vector<8x32xf32>
    %47 = arith.mulf %41, %46 : vector<8x32xf32>
    %48 = vector.broadcast %12 : vector<1x32xf32> to vector<8x32xf32>
    %49 = arith.mulf %47, %48 : vector<8x32xf32>
    %cst_20 = arith.constant dense<0.000000e+00> : vector<8xf32>
    %50 = vector.multi_reduction <add>, %49, %cst_20 [1] : vector<8x32xf32> to vector<8xf32>
    %51 = vector.shape_cast %50 : vector<8xf32> to vector<8x1xf32>
    %52 = vector.broadcast %13 : vector<1x1xf32> to vector<8x1xf32>
    %53 = arith.addf %51, %52 : vector<8x1xf32>
    %54 = arith.maximumf %17, %53 : vector<8x1xf32>
    %55 = arith.subf %17, %54 : vector<8x1xf32>
    %56 = math.exp %55 : vector<8x1xf32>
    %57 = arith.subf %53, %54 : vector<8x1xf32>
    %58 = math.exp %57 : vector<8x1xf32>
    %59 = arith.mulf %56, %18 : vector<8x1xf32>
    %60 = arith.addf %59, %58 : vector<8x1xf32>
    %61 = vector.broadcast %56 : vector<8x1xf32> to vector<8x32xf32>
    %62 = arith.mulf %61, %19 : vector<8x32xf32>
    %63 = vector.broadcast %58 : vector<8x1xf32> to vector<8x32xf32>
    %64 = arith.mulf %63, %47 : vector<8x32xf32>
    %65 = arith.addf %62, %64 : vector<8x32xf32>
    %66 = vector.extract_strided_slice %10 {offsets = [1, 0, 0], sizes = [1, 8, 128], strides = [1, 1, 1]} : vector<16x8x128xf32> to vector<1x8x128xf32>
    %67 = vector.shape_cast %66 : vector<1x8x128xf32> to vector<8x128xf32>
    %cst_21 = arith.constant dense<0.000000e+00> : vector<8x128xf32>
    %68 = tpu.matmul %41, %11, %cst_21 {dimension_numbers = #tpu.dot_dimension_numbers<[1], [0], [0], [1], [0, 0, 1, 1], [], []>} : vector<8x32xf32>, vector<32x128xf32>, vector<8x128xf32> -> vector<8x128xf32>
    %69 = arith.addf %67, %68 : vector<8x128xf32>
    %70 = arith.negf %69 : vector<8x128xf32>
    %71 = math.exp %70 : vector<8x128xf32>
    %cst_22 = arith.constant 1.000000e+00 : f32
    %72 = vector.broadcast %cst_22 : f32 to vector<8x128xf32>
    %73 = arith.addf %72, %71 : vector<8x128xf32>
    %74 = arith.divf %72, %73 : vector<8x128xf32>
    %75 = vector.extract_strided_slice %74 {offsets = [0, 0], sizes = [8, 32], strides = [1, 1]} : vector<8x128xf32> to vector<8x32xf32>
    %76 = vector.extract_strided_slice %74 {offsets = [0, 32], sizes = [8, 32], strides = [1, 1]} : vector<8x128xf32> to vector<8x32xf32>
    %77 = vector.extract_strided_slice %74 {offsets = [0, 64], sizes = [8, 32], strides = [1, 1]} : vector<8x128xf32> to vector<8x32xf32>
    %cst_23 = arith.constant 2.000000e+00 : f32
    %78 = vector.broadcast %cst_23 : f32 to vector<8x32xf32>
    %79 = arith.mulf %78, %77 : vector<8x32xf32>
    %cst_24 = arith.constant 1.000000e+00 : f32
    %80 = vector.broadcast %cst_24 : f32 to vector<8x32xf32>
    %81 = arith.subf %79, %80 : vector<8x32xf32>
    %82 = vector.extract_strided_slice %74 {offsets = [0, 96], sizes = [8, 32], strides = [1, 1]} : vector<8x128xf32> to vector<8x32xf32>
    %83 = arith.mulf %76, %39 : vector<8x32xf32>
    %84 = arith.mulf %75, %81 : vector<8x32xf32>
    %85 = arith.addf %83, %84 : vector<8x32xf32>
    %86 = math.tanh %85 : vector<8x32xf32>
    %87 = arith.mulf %82, %86 : vector<8x32xf32>
    %c1_i32 = arith.constant 1 : i32
    %88 = vector.broadcast %c1_i32 : i32 to vector<8x1xi32>
    %89 = arith.cmpi sgt, %14, %88 : vector<8x1xi32>
    %90 = arith.extui %89 : vector<8x1xi1> to vector<8x1xi32>
    %91 = arith.sitofp %90 : vector<8x1xi32> to vector<8x1xf32>
    %92 = vector.broadcast %91 : vector<8x1xf32> to vector<8x32xf32>
    %93 = arith.mulf %87, %92 : vector<8x32xf32>
    %94 = vector.broadcast %12 : vector<1x32xf32> to vector<8x32xf32>
    %95 = arith.mulf %93, %94 : vector<8x32xf32>
    %cst_25 = arith.constant dense<0.000000e+00> : vector<8xf32>
    %96 = vector.multi_reduction <add>, %95, %cst_25 [1] : vector<8x32xf32> to vector<8xf32>
    %97 = vector.shape_cast %96 : vector<8xf32> to vector<8x1xf32>
    %98 = vector.broadcast %13 : vector<1x1xf32> to vector<8x1xf32>
    %99 = arith.addf %97, %98 : vector<8x1xf32>
    %100 = arith.maximumf %54, %99 : vector<8x1xf32>
    %101 = arith.subf %54, %100 : vector<8x1xf32>
    %102 = math.exp %101 : vector<8x1xf32>
    %103 = arith.subf %99, %100 : vector<8x1xf32>
    %104 = math.exp %103 : vector<8x1xf32>
    %105 = arith.mulf %102, %60 : vector<8x1xf32>
    %106 = arith.addf %105, %104 : vector<8x1xf32>
    %107 = vector.broadcast %102 : vector<8x1xf32> to vector<8x32xf32>
    %108 = arith.mulf %107, %65 : vector<8x32xf32>
    %109 = vector.broadcast %104 : vector<8x1xf32> to vector<8x32xf32>
    %110 = arith.mulf %109, %93 : vector<8x32xf32>
    %111 = arith.addf %108, %110 : vector<8x32xf32>
    %112 = vector.extract_strided_slice %10 {offsets = [2, 0, 0], sizes = [1, 8, 128], strides = [1, 1, 1]} : vector<16x8x128xf32> to vector<1x8x128xf32>
    %113 = vector.shape_cast %112 : vector<1x8x128xf32> to vector<8x128xf32>
    %cst_26 = arith.constant dense<0.000000e+00> : vector<8x128xf32>
    %114 = tpu.matmul %87, %11, %cst_26 {dimension_numbers = #tpu.dot_dimension_numbers<[1], [0], [0], [1], [0, 0, 1, 1], [], []>} : vector<8x32xf32>, vector<32x128xf32>, vector<8x128xf32> -> vector<8x128xf32>
    %115 = arith.addf %113, %114 : vector<8x128xf32>
    %116 = arith.negf %115 : vector<8x128xf32>
    %117 = math.exp %116 : vector<8x128xf32>
    %cst_27 = arith.constant 1.000000e+00 : f32
    %118 = vector.broadcast %cst_27 : f32 to vector<8x128xf32>
    %119 = arith.addf %118, %117 : vector<8x128xf32>
    %120 = arith.divf %118, %119 : vector<8x128xf32>
    %121 = vector.extract_strided_slice %120 {offsets = [0, 0], sizes = [8, 32], strides = [1, 1]} : vector<8x128xf32> to vector<8x32xf32>
    %122 = vector.extract_strided_slice %120 {offsets = [0, 32], sizes = [8, 32], strides = [1, 1]} : vector<8x128xf32> to vector<8x32xf32>
    %123 = vector.extract_strided_slice %120 {offsets = [0, 64], sizes = [8, 32], strides = [1, 1]} : vector<8x128xf32> to vector<8x32xf32>
    %cst_28 = arith.constant 2.000000e+00 : f32
    %124 = vector.broadcast %cst_28 : f32 to vector<8x32xf32>
    %125 = arith.mulf %124, %123 : vector<8x32xf32>
    %cst_29 = arith.constant 1.000000e+00 : f32
    %126 = vector.broadcast %cst_29 : f32 to vector<8x32xf32>
    %127 = arith.subf %125, %126 : vector<8x32xf32>
    %128 = vector.extract_strided_slice %120 {offsets = [0, 96], sizes = [8, 32], strides = [1, 1]} : vector<8x128xf32> to vector<8x32xf32>
    %129 = arith.mulf %122, %85 : vector<8x32xf32>
    %130 = arith.mulf %121, %127 : vector<8x32xf32>
    %131 = arith.addf %129, %130 : vector<8x32xf32>
    %132 = math.tanh %131 : vector<8x32xf32>
    %133 = arith.mulf %128, %132 : vector<8x32xf32>
    %c2_i32 = arith.constant 2 : i32
    %134 = vector.broadcast %c2_i32 : i32 to vector<8x1xi32>
    %135 = arith.cmpi sgt, %14, %134 : vector<8x1xi32>
    %136 = arith.extui %135 : vector<8x1xi1> to vector<8x1xi32>
    %137 = arith.sitofp %136 : vector<8x1xi32> to vector<8x1xf32>
    %138 = vector.broadcast %137 : vector<8x1xf32> to vector<8x32xf32>
    %139 = arith.mulf %133, %138 : vector<8x32xf32>
    %140 = vector.broadcast %12 : vector<1x32xf32> to vector<8x32xf32>
    %141 = arith.mulf %139, %140 : vector<8x32xf32>
    %cst_30 = arith.constant dense<0.000000e+00> : vector<8xf32>
    %142 = vector.multi_reduction <add>, %141, %cst_30 [1] : vector<8x32xf32> to vector<8xf32>
    %143 = vector.shape_cast %142 : vector<8xf32> to vector<8x1xf32>
    %144 = vector.broadcast %13 : vector<1x1xf32> to vector<8x1xf32>
    %145 = arith.addf %143, %144 : vector<8x1xf32>
    %146 = arith.maximumf %100, %145 : vector<8x1xf32>
    %147 = arith.subf %100, %146 : vector<8x1xf32>
    %148 = math.exp %147 : vector<8x1xf32>
    %149 = arith.subf %145, %146 : vector<8x1xf32>
    %150 = math.exp %149 : vector<8x1xf32>
    %151 = arith.mulf %148, %106 : vector<8x1xf32>
    %152 = arith.addf %151, %150 : vector<8x1xf32>
    %153 = vector.broadcast %148 : vector<8x1xf32> to vector<8x32xf32>
    %154 = arith.mulf %153, %111 : vector<8x32xf32>
    %155 = vector.broadcast %150 : vector<8x1xf32> to vector<8x32xf32>
    %156 = arith.mulf %155, %139 : vector<8x32xf32>
    %157 = arith.addf %154, %156 : vector<8x32xf32>
    %158 = vector.extract_strided_slice %10 {offsets = [3, 0, 0], sizes = [1, 8, 128], strides = [1, 1, 1]} : vector<16x8x128xf32> to vector<1x8x128xf32>
    %159 = vector.shape_cast %158 : vector<1x8x128xf32> to vector<8x128xf32>
    %cst_31 = arith.constant dense<0.000000e+00> : vector<8x128xf32>
    %160 = tpu.matmul %133, %11, %cst_31 {dimension_numbers = #tpu.dot_dimension_numbers<[1], [0], [0], [1], [0, 0, 1, 1], [], []>} : vector<8x32xf32>, vector<32x128xf32>, vector<8x128xf32> -> vector<8x128xf32>
    %161 = arith.addf %159, %160 : vector<8x128xf32>
    %162 = arith.negf %161 : vector<8x128xf32>
    %163 = math.exp %162 : vector<8x128xf32>
    %cst_32 = arith.constant 1.000000e+00 : f32
    %164 = vector.broadcast %cst_32 : f32 to vector<8x128xf32>
    %165 = arith.addf %164, %163 : vector<8x128xf32>
    %166 = arith.divf %164, %165 : vector<8x128xf32>
    %167 = vector.extract_strided_slice %166 {offsets = [0, 0], sizes = [8, 32], strides = [1, 1]} : vector<8x128xf32> to vector<8x32xf32>
    %168 = vector.extract_strided_slice %166 {offsets = [0, 32], sizes = [8, 32], strides = [1, 1]} : vector<8x128xf32> to vector<8x32xf32>
    %169 = vector.extract_strided_slice %166 {offsets = [0, 64], sizes = [8, 32], strides = [1, 1]} : vector<8x128xf32> to vector<8x32xf32>
    %cst_33 = arith.constant 2.000000e+00 : f32
    %170 = vector.broadcast %cst_33 : f32 to vector<8x32xf32>
    %171 = arith.mulf %170, %169 : vector<8x32xf32>
    %cst_34 = arith.constant 1.000000e+00 : f32
    %172 = vector.broadcast %cst_34 : f32 to vector<8x32xf32>
    %173 = arith.subf %171, %172 : vector<8x32xf32>
    %174 = vector.extract_strided_slice %166 {offsets = [0, 96], sizes = [8, 32], strides = [1, 1]} : vector<8x128xf32> to vector<8x32xf32>
    %175 = arith.mulf %168, %131 : vector<8x32xf32>
    %176 = arith.mulf %167, %173 : vector<8x32xf32>
    %177 = arith.addf %175, %176 : vector<8x32xf32>
    %178 = math.tanh %177 : vector<8x32xf32>
    %179 = arith.mulf %174, %178 : vector<8x32xf32>
    %c3_i32 = arith.constant 3 : i32
    %180 = vector.broadcast %c3_i32 : i32 to vector<8x1xi32>
    %181 = arith.cmpi sgt, %14, %180 : vector<8x1xi32>
    %182 = arith.extui %181 : vector<8x1xi1> to vector<8x1xi32>
    %183 = arith.sitofp %182 : vector<8x1xi32> to vector<8x1xf32>
    %184 = vector.broadcast %183 : vector<8x1xf32> to vector<8x32xf32>
    %185 = arith.mulf %179, %184 : vector<8x32xf32>
    %186 = vector.broadcast %12 : vector<1x32xf32> to vector<8x32xf32>
    %187 = arith.mulf %185, %186 : vector<8x32xf32>
    %cst_35 = arith.constant dense<0.000000e+00> : vector<8xf32>
    %188 = vector.multi_reduction <add>, %187, %cst_35 [1] : vector<8x32xf32> to vector<8xf32>
    %189 = vector.shape_cast %188 : vector<8xf32> to vector<8x1xf32>
    %190 = vector.broadcast %13 : vector<1x1xf32> to vector<8x1xf32>
    %191 = arith.addf %189, %190 : vector<8x1xf32>
    %192 = arith.maximumf %146, %191 : vector<8x1xf32>
    %193 = arith.subf %146, %192 : vector<8x1xf32>
    %194 = math.exp %193 : vector<8x1xf32>
    %195 = arith.subf %191, %192 : vector<8x1xf32>
    %196 = math.exp %195 : vector<8x1xf32>
    %197 = arith.mulf %194, %152 : vector<8x1xf32>
    %198 = arith.addf %197, %196 : vector<8x1xf32>
    %199 = vector.broadcast %194 : vector<8x1xf32> to vector<8x32xf32>
    %200 = arith.mulf %199, %157 : vector<8x32xf32>
    %201 = vector.broadcast %196 : vector<8x1xf32> to vector<8x32xf32>
    %202 = arith.mulf %201, %185 : vector<8x32xf32>
    %203 = arith.addf %200, %202 : vector<8x32xf32>
    %204 = vector.extract_strided_slice %10 {offsets = [4, 0, 0], sizes = [1, 8, 128], strides = [1, 1, 1]} : vector<16x8x128xf32> to vector<1x8x128xf32>
    %205 = vector.shape_cast %204 : vector<1x8x128xf32> to vector<8x128xf32>
    %cst_36 = arith.constant dense<0.000000e+00> : vector<8x128xf32>
    %206 = tpu.matmul %179, %11, %cst_36 {dimension_numbers = #tpu.dot_dimension_numbers<[1], [0], [0], [1], [0, 0, 1, 1], [], []>} : vector<8x32xf32>, vector<32x128xf32>, vector<8x128xf32> -> vector<8x128xf32>
    %207 = arith.addf %205, %206 : vector<8x128xf32>
    %208 = arith.negf %207 : vector<8x128xf32>
    %209 = math.exp %208 : vector<8x128xf32>
    %cst_37 = arith.constant 1.000000e+00 : f32
    %210 = vector.broadcast %cst_37 : f32 to vector<8x128xf32>
    %211 = arith.addf %210, %209 : vector<8x128xf32>
    %212 = arith.divf %210, %211 : vector<8x128xf32>
    %213 = vector.extract_strided_slice %212 {offsets = [0, 0], sizes = [8, 32], strides = [1, 1]} : vector<8x128xf32> to vector<8x32xf32>
    %214 = vector.extract_strided_slice %212 {offsets = [0, 32], sizes = [8, 32], strides = [1, 1]} : vector<8x128xf32> to vector<8x32xf32>
    %215 = vector.extract_strided_slice %212 {offsets = [0, 64], sizes = [8, 32], strides = [1, 1]} : vector<8x128xf32> to vector<8x32xf32>
    %cst_38 = arith.constant 2.000000e+00 : f32
    %216 = vector.broadcast %cst_38 : f32 to vector<8x32xf32>
    %217 = arith.mulf %216, %215 : vector<8x32xf32>
    %cst_39 = arith.constant 1.000000e+00 : f32
    %218 = vector.broadcast %cst_39 : f32 to vector<8x32xf32>
    %219 = arith.subf %217, %218 : vector<8x32xf32>
    %220 = vector.extract_strided_slice %212 {offsets = [0, 96], sizes = [8, 32], strides = [1, 1]} : vector<8x128xf32> to vector<8x32xf32>
    %221 = arith.mulf %214, %177 : vector<8x32xf32>
    %222 = arith.mulf %213, %219 : vector<8x32xf32>
    %223 = arith.addf %221, %222 : vector<8x32xf32>
    %224 = math.tanh %223 : vector<8x32xf32>
    %225 = arith.mulf %220, %224 : vector<8x32xf32>
    %c4_i32 = arith.constant 4 : i32
    %226 = vector.broadcast %c4_i32 : i32 to vector<8x1xi32>
    %227 = arith.cmpi sgt, %14, %226 : vector<8x1xi32>
    %228 = arith.extui %227 : vector<8x1xi1> to vector<8x1xi32>
    %229 = arith.sitofp %228 : vector<8x1xi32> to vector<8x1xf32>
    %230 = vector.broadcast %229 : vector<8x1xf32> to vector<8x32xf32>
    %231 = arith.mulf %225, %230 : vector<8x32xf32>
    %232 = vector.broadcast %12 : vector<1x32xf32> to vector<8x32xf32>
    %233 = arith.mulf %231, %232 : vector<8x32xf32>
    %cst_40 = arith.constant dense<0.000000e+00> : vector<8xf32>
    %234 = vector.multi_reduction <add>, %233, %cst_40 [1] : vector<8x32xf32> to vector<8xf32>
    %235 = vector.shape_cast %234 : vector<8xf32> to vector<8x1xf32>
    %236 = vector.broadcast %13 : vector<1x1xf32> to vector<8x1xf32>
    %237 = arith.addf %235, %236 : vector<8x1xf32>
    %238 = arith.maximumf %192, %237 : vector<8x1xf32>
    %239 = arith.subf %192, %238 : vector<8x1xf32>
    %240 = math.exp %239 : vector<8x1xf32>
    %241 = arith.subf %237, %238 : vector<8x1xf32>
    %242 = math.exp %241 : vector<8x1xf32>
    %243 = arith.mulf %240, %198 : vector<8x1xf32>
    %244 = arith.addf %243, %242 : vector<8x1xf32>
    %245 = vector.broadcast %240 : vector<8x1xf32> to vector<8x32xf32>
    %246 = arith.mulf %245, %203 : vector<8x32xf32>
    %247 = vector.broadcast %242 : vector<8x1xf32> to vector<8x32xf32>
    %248 = arith.mulf %247, %231 : vector<8x32xf32>
    %249 = arith.addf %246, %248 : vector<8x32xf32>
    %250 = vector.extract_strided_slice %10 {offsets = [5, 0, 0], sizes = [1, 8, 128], strides = [1, 1, 1]} : vector<16x8x128xf32> to vector<1x8x128xf32>
    %251 = vector.shape_cast %250 : vector<1x8x128xf32> to vector<8x128xf32>
    %cst_41 = arith.constant dense<0.000000e+00> : vector<8x128xf32>
    %252 = tpu.matmul %225, %11, %cst_41 {dimension_numbers = #tpu.dot_dimension_numbers<[1], [0], [0], [1], [0, 0, 1, 1], [], []>} : vector<8x32xf32>, vector<32x128xf32>, vector<8x128xf32> -> vector<8x128xf32>
    %253 = arith.addf %251, %252 : vector<8x128xf32>
    %254 = arith.negf %253 : vector<8x128xf32>
    %255 = math.exp %254 : vector<8x128xf32>
    %cst_42 = arith.constant 1.000000e+00 : f32
    %256 = vector.broadcast %cst_42 : f32 to vector<8x128xf32>
    %257 = arith.addf %256, %255 : vector<8x128xf32>
    %258 = arith.divf %256, %257 : vector<8x128xf32>
    %259 = vector.extract_strided_slice %258 {offsets = [0, 0], sizes = [8, 32], strides = [1, 1]} : vector<8x128xf32> to vector<8x32xf32>
    %260 = vector.extract_strided_slice %258 {offsets = [0, 32], sizes = [8, 32], strides = [1, 1]} : vector<8x128xf32> to vector<8x32xf32>
    %261 = vector.extract_strided_slice %258 {offsets = [0, 64], sizes = [8, 32], strides = [1, 1]} : vector<8x128xf32> to vector<8x32xf32>
    %cst_43 = arith.constant 2.000000e+00 : f32
    %262 = vector.broadcast %cst_43 : f32 to vector<8x32xf32>
    %263 = arith.mulf %262, %261 : vector<8x32xf32>
    %cst_44 = arith.constant 1.000000e+00 : f32
    %264 = vector.broadcast %cst_44 : f32 to vector<8x32xf32>
    %265 = arith.subf %263, %264 : vector<8x32xf32>
    %266 = vector.extract_strided_slice %258 {offsets = [0, 96], sizes = [8, 32], strides = [1, 1]} : vector<8x128xf32> to vector<8x32xf32>
    %267 = arith.mulf %260, %223 : vector<8x32xf32>
    %268 = arith.mulf %259, %265 : vector<8x32xf32>
    %269 = arith.addf %267, %268 : vector<8x32xf32>
    %270 = math.tanh %269 : vector<8x32xf32>
    %271 = arith.mulf %266, %270 : vector<8x32xf32>
    %c5_i32 = arith.constant 5 : i32
    %272 = vector.broadcast %c5_i32 : i32 to vector<8x1xi32>
    %273 = arith.cmpi sgt, %14, %272 : vector<8x1xi32>
    %274 = arith.extui %273 : vector<8x1xi1> to vector<8x1xi32>
    %275 = arith.sitofp %274 : vector<8x1xi32> to vector<8x1xf32>
    %276 = vector.broadcast %275 : vector<8x1xf32> to vector<8x32xf32>
    %277 = arith.mulf %271, %276 : vector<8x32xf32>
    %278 = vector.broadcast %12 : vector<1x32xf32> to vector<8x32xf32>
    %279 = arith.mulf %277, %278 : vector<8x32xf32>
    %cst_45 = arith.constant dense<0.000000e+00> : vector<8xf32>
    %280 = vector.multi_reduction <add>, %279, %cst_45 [1] : vector<8x32xf32> to vector<8xf32>
    %281 = vector.shape_cast %280 : vector<8xf32> to vector<8x1xf32>
    %282 = vector.broadcast %13 : vector<1x1xf32> to vector<8x1xf32>
    %283 = arith.addf %281, %282 : vector<8x1xf32>
    %284 = arith.maximumf %238, %283 : vector<8x1xf32>
    %285 = arith.subf %238, %284 : vector<8x1xf32>
    %286 = math.exp %285 : vector<8x1xf32>
    %287 = arith.subf %283, %284 : vector<8x1xf32>
    %288 = math.exp %287 : vector<8x1xf32>
    %289 = arith.mulf %286, %244 : vector<8x1xf32>
    %290 = arith.addf %289, %288 : vector<8x1xf32>
    %291 = vector.broadcast %286 : vector<8x1xf32> to vector<8x32xf32>
    %292 = arith.mulf %291, %249 : vector<8x32xf32>
    %293 = vector.broadcast %288 : vector<8x1xf32> to vector<8x32xf32>
    %294 = arith.mulf %293, %277 : vector<8x32xf32>
    %295 = arith.addf %292, %294 : vector<8x32xf32>
    %296 = vector.extract_strided_slice %10 {offsets = [6, 0, 0], sizes = [1, 8, 128], strides = [1, 1, 1]} : vector<16x8x128xf32> to vector<1x8x128xf32>
    %297 = vector.shape_cast %296 : vector<1x8x128xf32> to vector<8x128xf32>
    %cst_46 = arith.constant dense<0.000000e+00> : vector<8x128xf32>
    %298 = tpu.matmul %271, %11, %cst_46 {dimension_numbers = #tpu.dot_dimension_numbers<[1], [0], [0], [1], [0, 0, 1, 1], [], []>} : vector<8x32xf32>, vector<32x128xf32>, vector<8x128xf32> -> vector<8x128xf32>
    %299 = arith.addf %297, %298 : vector<8x128xf32>
    %300 = arith.negf %299 : vector<8x128xf32>
    %301 = math.exp %300 : vector<8x128xf32>
    %cst_47 = arith.constant 1.000000e+00 : f32
    %302 = vector.broadcast %cst_47 : f32 to vector<8x128xf32>
    %303 = arith.addf %302, %301 : vector<8x128xf32>
    %304 = arith.divf %302, %303 : vector<8x128xf32>
    %305 = vector.extract_strided_slice %304 {offsets = [0, 0], sizes = [8, 32], strides = [1, 1]} : vector<8x128xf32> to vector<8x32xf32>
    %306 = vector.extract_strided_slice %304 {offsets = [0, 32], sizes = [8, 32], strides = [1, 1]} : vector<8x128xf32> to vector<8x32xf32>
    %307 = vector.extract_strided_slice %304 {offsets = [0, 64], sizes = [8, 32], strides = [1, 1]} : vector<8x128xf32> to vector<8x32xf32>
    %cst_48 = arith.constant 2.000000e+00 : f32
    %308 = vector.broadcast %cst_48 : f32 to vector<8x32xf32>
    %309 = arith.mulf %308, %307 : vector<8x32xf32>
    %cst_49 = arith.constant 1.000000e+00 : f32
    %310 = vector.broadcast %cst_49 : f32 to vector<8x32xf32>
    %311 = arith.subf %309, %310 : vector<8x32xf32>
    %312 = vector.extract_strided_slice %304 {offsets = [0, 96], sizes = [8, 32], strides = [1, 1]} : vector<8x128xf32> to vector<8x32xf32>
    %313 = arith.mulf %306, %269 : vector<8x32xf32>
    %314 = arith.mulf %305, %311 : vector<8x32xf32>
    %315 = arith.addf %313, %314 : vector<8x32xf32>
    %316 = math.tanh %315 : vector<8x32xf32>
    %317 = arith.mulf %312, %316 : vector<8x32xf32>
    %c6_i32 = arith.constant 6 : i32
    %318 = vector.broadcast %c6_i32 : i32 to vector<8x1xi32>
    %319 = arith.cmpi sgt, %14, %318 : vector<8x1xi32>
    %320 = arith.extui %319 : vector<8x1xi1> to vector<8x1xi32>
    %321 = arith.sitofp %320 : vector<8x1xi32> to vector<8x1xf32>
    %322 = vector.broadcast %321 : vector<8x1xf32> to vector<8x32xf32>
    %323 = arith.mulf %317, %322 : vector<8x32xf32>
    %324 = vector.broadcast %12 : vector<1x32xf32> to vector<8x32xf32>
    %325 = arith.mulf %323, %324 : vector<8x32xf32>
    %cst_50 = arith.constant dense<0.000000e+00> : vector<8xf32>
    %326 = vector.multi_reduction <add>, %325, %cst_50 [1] : vector<8x32xf32> to vector<8xf32>
    %327 = vector.shape_cast %326 : vector<8xf32> to vector<8x1xf32>
    %328 = vector.broadcast %13 : vector<1x1xf32> to vector<8x1xf32>
    %329 = arith.addf %327, %328 : vector<8x1xf32>
    %330 = arith.maximumf %284, %329 : vector<8x1xf32>
    %331 = arith.subf %284, %330 : vector<8x1xf32>
    %332 = math.exp %331 : vector<8x1xf32>
    %333 = arith.subf %329, %330 : vector<8x1xf32>
    %334 = math.exp %333 : vector<8x1xf32>
    %335 = arith.mulf %332, %290 : vector<8x1xf32>
    %336 = arith.addf %335, %334 : vector<8x1xf32>
    %337 = vector.broadcast %332 : vector<8x1xf32> to vector<8x32xf32>
    %338 = arith.mulf %337, %295 : vector<8x32xf32>
    %339 = vector.broadcast %334 : vector<8x1xf32> to vector<8x32xf32>
    %340 = arith.mulf %339, %323 : vector<8x32xf32>
    %341 = arith.addf %338, %340 : vector<8x32xf32>
    %342 = vector.extract_strided_slice %10 {offsets = [7, 0, 0], sizes = [1, 8, 128], strides = [1, 1, 1]} : vector<16x8x128xf32> to vector<1x8x128xf32>
    %343 = vector.shape_cast %342 : vector<1x8x128xf32> to vector<8x128xf32>
    %cst_51 = arith.constant dense<0.000000e+00> : vector<8x128xf32>
    %344 = tpu.matmul %317, %11, %cst_51 {dimension_numbers = #tpu.dot_dimension_numbers<[1], [0], [0], [1], [0, 0, 1, 1], [], []>} : vector<8x32xf32>, vector<32x128xf32>, vector<8x128xf32> -> vector<8x128xf32>
    %345 = arith.addf %343, %344 : vector<8x128xf32>
    %346 = arith.negf %345 : vector<8x128xf32>
    %347 = math.exp %346 : vector<8x128xf32>
    %cst_52 = arith.constant 1.000000e+00 : f32
    %348 = vector.broadcast %cst_52 : f32 to vector<8x128xf32>
    %349 = arith.addf %348, %347 : vector<8x128xf32>
    %350 = arith.divf %348, %349 : vector<8x128xf32>
    %351 = vector.extract_strided_slice %350 {offsets = [0, 0], sizes = [8, 32], strides = [1, 1]} : vector<8x128xf32> to vector<8x32xf32>
    %352 = vector.extract_strided_slice %350 {offsets = [0, 32], sizes = [8, 32], strides = [1, 1]} : vector<8x128xf32> to vector<8x32xf32>
    %353 = vector.extract_strided_slice %350 {offsets = [0, 64], sizes = [8, 32], strides = [1, 1]} : vector<8x128xf32> to vector<8x32xf32>
    %cst_53 = arith.constant 2.000000e+00 : f32
    %354 = vector.broadcast %cst_53 : f32 to vector<8x32xf32>
    %355 = arith.mulf %354, %353 : vector<8x32xf32>
    %cst_54 = arith.constant 1.000000e+00 : f32
    %356 = vector.broadcast %cst_54 : f32 to vector<8x32xf32>
    %357 = arith.subf %355, %356 : vector<8x32xf32>
    %358 = vector.extract_strided_slice %350 {offsets = [0, 96], sizes = [8, 32], strides = [1, 1]} : vector<8x128xf32> to vector<8x32xf32>
    %359 = arith.mulf %352, %315 : vector<8x32xf32>
    %360 = arith.mulf %351, %357 : vector<8x32xf32>
    %361 = arith.addf %359, %360 : vector<8x32xf32>
    %362 = math.tanh %361 : vector<8x32xf32>
    %363 = arith.mulf %358, %362 : vector<8x32xf32>
    %c7_i32 = arith.constant 7 : i32
    %364 = vector.broadcast %c7_i32 : i32 to vector<8x1xi32>
    %365 = arith.cmpi sgt, %14, %364 : vector<8x1xi32>
    %366 = arith.extui %365 : vector<8x1xi1> to vector<8x1xi32>
    %367 = arith.sitofp %366 : vector<8x1xi32> to vector<8x1xf32>
    %368 = vector.broadcast %367 : vector<8x1xf32> to vector<8x32xf32>
    %369 = arith.mulf %363, %368 : vector<8x32xf32>
    %370 = vector.broadcast %12 : vector<1x32xf32> to vector<8x32xf32>
    %371 = arith.mulf %369, %370 : vector<8x32xf32>
    %cst_55 = arith.constant dense<0.000000e+00> : vector<8xf32>
    %372 = vector.multi_reduction <add>, %371, %cst_55 [1] : vector<8x32xf32> to vector<8xf32>
    %373 = vector.shape_cast %372 : vector<8xf32> to vector<8x1xf32>
    %374 = vector.broadcast %13 : vector<1x1xf32> to vector<8x1xf32>
    %375 = arith.addf %373, %374 : vector<8x1xf32>
    %376 = arith.maximumf %330, %375 : vector<8x1xf32>
    %377 = arith.subf %330, %376 : vector<8x1xf32>
    %378 = math.exp %377 : vector<8x1xf32>
    %379 = arith.subf %375, %376 : vector<8x1xf32>
    %380 = math.exp %379 : vector<8x1xf32>
    %381 = arith.mulf %378, %336 : vector<8x1xf32>
    %382 = arith.addf %381, %380 : vector<8x1xf32>
    %383 = vector.broadcast %378 : vector<8x1xf32> to vector<8x32xf32>
    %384 = arith.mulf %383, %341 : vector<8x32xf32>
    %385 = vector.broadcast %380 : vector<8x1xf32> to vector<8x32xf32>
    %386 = arith.mulf %385, %369 : vector<8x32xf32>
    %387 = arith.addf %384, %386 : vector<8x32xf32>
    %388 = vector.extract_strided_slice %10 {offsets = [8, 0, 0], sizes = [1, 8, 128], strides = [1, 1, 1]} : vector<16x8x128xf32> to vector<1x8x128xf32>
    %389 = vector.shape_cast %388 : vector<1x8x128xf32> to vector<8x128xf32>
    %cst_56 = arith.constant dense<0.000000e+00> : vector<8x128xf32>
    %390 = tpu.matmul %363, %11, %cst_56 {dimension_numbers = #tpu.dot_dimension_numbers<[1], [0], [0], [1], [0, 0, 1, 1], [], []>} : vector<8x32xf32>, vector<32x128xf32>, vector<8x128xf32> -> vector<8x128xf32>
    %391 = arith.addf %389, %390 : vector<8x128xf32>
    %392 = arith.negf %391 : vector<8x128xf32>
    %393 = math.exp %392 : vector<8x128xf32>
    %cst_57 = arith.constant 1.000000e+00 : f32
    %394 = vector.broadcast %cst_57 : f32 to vector<8x128xf32>
    %395 = arith.addf %394, %393 : vector<8x128xf32>
    %396 = arith.divf %394, %395 : vector<8x128xf32>
    %397 = vector.extract_strided_slice %396 {offsets = [0, 0], sizes = [8, 32], strides = [1, 1]} : vector<8x128xf32> to vector<8x32xf32>
    %398 = vector.extract_strided_slice %396 {offsets = [0, 32], sizes = [8, 32], strides = [1, 1]} : vector<8x128xf32> to vector<8x32xf32>
    %399 = vector.extract_strided_slice %396 {offsets = [0, 64], sizes = [8, 32], strides = [1, 1]} : vector<8x128xf32> to vector<8x32xf32>
    %cst_58 = arith.constant 2.000000e+00 : f32
    %400 = vector.broadcast %cst_58 : f32 to vector<8x32xf32>
    %401 = arith.mulf %400, %399 : vector<8x32xf32>
    %cst_59 = arith.constant 1.000000e+00 : f32
    %402 = vector.broadcast %cst_59 : f32 to vector<8x32xf32>
    %403 = arith.subf %401, %402 : vector<8x32xf32>
    %404 = vector.extract_strided_slice %396 {offsets = [0, 96], sizes = [8, 32], strides = [1, 1]} : vector<8x128xf32> to vector<8x32xf32>
    %405 = arith.mulf %398, %361 : vector<8x32xf32>
    %406 = arith.mulf %397, %403 : vector<8x32xf32>
    %407 = arith.addf %405, %406 : vector<8x32xf32>
    %408 = math.tanh %407 : vector<8x32xf32>
    %409 = arith.mulf %404, %408 : vector<8x32xf32>
    %c8_i32 = arith.constant 8 : i32
    %410 = vector.broadcast %c8_i32 : i32 to vector<8x1xi32>
    %411 = arith.cmpi sgt, %14, %410 : vector<8x1xi32>
    %412 = arith.extui %411 : vector<8x1xi1> to vector<8x1xi32>
    %413 = arith.sitofp %412 : vector<8x1xi32> to vector<8x1xf32>
    %414 = vector.broadcast %413 : vector<8x1xf32> to vector<8x32xf32>
    %415 = arith.mulf %409, %414 : vector<8x32xf32>
    %416 = vector.broadcast %12 : vector<1x32xf32> to vector<8x32xf32>
    %417 = arith.mulf %415, %416 : vector<8x32xf32>
    %cst_60 = arith.constant dense<0.000000e+00> : vector<8xf32>
    %418 = vector.multi_reduction <add>, %417, %cst_60 [1] : vector<8x32xf32> to vector<8xf32>
    %419 = vector.shape_cast %418 : vector<8xf32> to vector<8x1xf32>
    %420 = vector.broadcast %13 : vector<1x1xf32> to vector<8x1xf32>
    %421 = arith.addf %419, %420 : vector<8x1xf32>
    %422 = arith.maximumf %376, %421 : vector<8x1xf32>
    %423 = arith.subf %376, %422 : vector<8x1xf32>
    %424 = math.exp %423 : vector<8x1xf32>
    %425 = arith.subf %421, %422 : vector<8x1xf32>
    %426 = math.exp %425 : vector<8x1xf32>
    %427 = arith.mulf %424, %382 : vector<8x1xf32>
    %428 = arith.addf %427, %426 : vector<8x1xf32>
    %429 = vector.broadcast %424 : vector<8x1xf32> to vector<8x32xf32>
    %430 = arith.mulf %429, %387 : vector<8x32xf32>
    %431 = vector.broadcast %426 : vector<8x1xf32> to vector<8x32xf32>
    %432 = arith.mulf %431, %415 : vector<8x32xf32>
    %433 = arith.addf %430, %432 : vector<8x32xf32>
    %434 = vector.extract_strided_slice %10 {offsets = [9, 0, 0], sizes = [1, 8, 128], strides = [1, 1, 1]} : vector<16x8x128xf32> to vector<1x8x128xf32>
    %435 = vector.shape_cast %434 : vector<1x8x128xf32> to vector<8x128xf32>
    %cst_61 = arith.constant dense<0.000000e+00> : vector<8x128xf32>
    %436 = tpu.matmul %409, %11, %cst_61 {dimension_numbers = #tpu.dot_dimension_numbers<[1], [0], [0], [1], [0, 0, 1, 1], [], []>} : vector<8x32xf32>, vector<32x128xf32>, vector<8x128xf32> -> vector<8x128xf32>
    %437 = arith.addf %435, %436 : vector<8x128xf32>
    %438 = arith.negf %437 : vector<8x128xf32>
    %439 = math.exp %438 : vector<8x128xf32>
    %cst_62 = arith.constant 1.000000e+00 : f32
    %440 = vector.broadcast %cst_62 : f32 to vector<8x128xf32>
    %441 = arith.addf %440, %439 : vector<8x128xf32>
    %442 = arith.divf %440, %441 : vector<8x128xf32>
    %443 = vector.extract_strided_slice %442 {offsets = [0, 0], sizes = [8, 32], strides = [1, 1]} : vector<8x128xf32> to vector<8x32xf32>
    %444 = vector.extract_strided_slice %442 {offsets = [0, 32], sizes = [8, 32], strides = [1, 1]} : vector<8x128xf32> to vector<8x32xf32>
    %445 = vector.extract_strided_slice %442 {offsets = [0, 64], sizes = [8, 32], strides = [1, 1]} : vector<8x128xf32> to vector<8x32xf32>
    %cst_63 = arith.constant 2.000000e+00 : f32
    %446 = vector.broadcast %cst_63 : f32 to vector<8x32xf32>
    %447 = arith.mulf %446, %445 : vector<8x32xf32>
    %cst_64 = arith.constant 1.000000e+00 : f32
    %448 = vector.broadcast %cst_64 : f32 to vector<8x32xf32>
    %449 = arith.subf %447, %448 : vector<8x32xf32>
    %450 = vector.extract_strided_slice %442 {offsets = [0, 96], sizes = [8, 32], strides = [1, 1]} : vector<8x128xf32> to vector<8x32xf32>
    %451 = arith.mulf %444, %407 : vector<8x32xf32>
    %452 = arith.mulf %443, %449 : vector<8x32xf32>
    %453 = arith.addf %451, %452 : vector<8x32xf32>
    %454 = math.tanh %453 : vector<8x32xf32>
    %455 = arith.mulf %450, %454 : vector<8x32xf32>
    %c9_i32 = arith.constant 9 : i32
    %456 = vector.broadcast %c9_i32 : i32 to vector<8x1xi32>
    %457 = arith.cmpi sgt, %14, %456 : vector<8x1xi32>
    %458 = arith.extui %457 : vector<8x1xi1> to vector<8x1xi32>
    %459 = arith.sitofp %458 : vector<8x1xi32> to vector<8x1xf32>
    %460 = vector.broadcast %459 : vector<8x1xf32> to vector<8x32xf32>
    %461 = arith.mulf %455, %460 : vector<8x32xf32>
    %462 = vector.broadcast %12 : vector<1x32xf32> to vector<8x32xf32>
    %463 = arith.mulf %461, %462 : vector<8x32xf32>
    %cst_65 = arith.constant dense<0.000000e+00> : vector<8xf32>
    %464 = vector.multi_reduction <add>, %463, %cst_65 [1] : vector<8x32xf32> to vector<8xf32>
    %465 = vector.shape_cast %464 : vector<8xf32> to vector<8x1xf32>
    %466 = vector.broadcast %13 : vector<1x1xf32> to vector<8x1xf32>
    %467 = arith.addf %465, %466 : vector<8x1xf32>
    %468 = arith.maximumf %422, %467 : vector<8x1xf32>
    %469 = arith.subf %422, %468 : vector<8x1xf32>
    %470 = math.exp %469 : vector<8x1xf32>
    %471 = arith.subf %467, %468 : vector<8x1xf32>
    %472 = math.exp %471 : vector<8x1xf32>
    %473 = arith.mulf %470, %428 : vector<8x1xf32>
    %474 = arith.addf %473, %472 : vector<8x1xf32>
    %475 = vector.broadcast %470 : vector<8x1xf32> to vector<8x32xf32>
    %476 = arith.mulf %475, %433 : vector<8x32xf32>
    %477 = vector.broadcast %472 : vector<8x1xf32> to vector<8x32xf32>
    %478 = arith.mulf %477, %461 : vector<8x32xf32>
    %479 = arith.addf %476, %478 : vector<8x32xf32>
    %480 = vector.extract_strided_slice %10 {offsets = [10, 0, 0], sizes = [1, 8, 128], strides = [1, 1, 1]} : vector<16x8x128xf32> to vector<1x8x128xf32>
    %481 = vector.shape_cast %480 : vector<1x8x128xf32> to vector<8x128xf32>
    %cst_66 = arith.constant dense<0.000000e+00> : vector<8x128xf32>
    %482 = tpu.matmul %455, %11, %cst_66 {dimension_numbers = #tpu.dot_dimension_numbers<[1], [0], [0], [1], [0, 0, 1, 1], [], []>} : vector<8x32xf32>, vector<32x128xf32>, vector<8x128xf32> -> vector<8x128xf32>
    %483 = arith.addf %481, %482 : vector<8x128xf32>
    %484 = arith.negf %483 : vector<8x128xf32>
    %485 = math.exp %484 : vector<8x128xf32>
    %cst_67 = arith.constant 1.000000e+00 : f32
    %486 = vector.broadcast %cst_67 : f32 to vector<8x128xf32>
    %487 = arith.addf %486, %485 : vector<8x128xf32>
    %488 = arith.divf %486, %487 : vector<8x128xf32>
    %489 = vector.extract_strided_slice %488 {offsets = [0, 0], sizes = [8, 32], strides = [1, 1]} : vector<8x128xf32> to vector<8x32xf32>
    %490 = vector.extract_strided_slice %488 {offsets = [0, 32], sizes = [8, 32], strides = [1, 1]} : vector<8x128xf32> to vector<8x32xf32>
    %491 = vector.extract_strided_slice %488 {offsets = [0, 64], sizes = [8, 32], strides = [1, 1]} : vector<8x128xf32> to vector<8x32xf32>
    %cst_68 = arith.constant 2.000000e+00 : f32
    %492 = vector.broadcast %cst_68 : f32 to vector<8x32xf32>
    %493 = arith.mulf %492, %491 : vector<8x32xf32>
    %cst_69 = arith.constant 1.000000e+00 : f32
    %494 = vector.broadcast %cst_69 : f32 to vector<8x32xf32>
    %495 = arith.subf %493, %494 : vector<8x32xf32>
    %496 = vector.extract_strided_slice %488 {offsets = [0, 96], sizes = [8, 32], strides = [1, 1]} : vector<8x128xf32> to vector<8x32xf32>
    %497 = arith.mulf %490, %453 : vector<8x32xf32>
    %498 = arith.mulf %489, %495 : vector<8x32xf32>
    %499 = arith.addf %497, %498 : vector<8x32xf32>
    %500 = math.tanh %499 : vector<8x32xf32>
    %501 = arith.mulf %496, %500 : vector<8x32xf32>
    %c10_i32 = arith.constant 10 : i32
    %502 = vector.broadcast %c10_i32 : i32 to vector<8x1xi32>
    %503 = arith.cmpi sgt, %14, %502 : vector<8x1xi32>
    %504 = arith.extui %503 : vector<8x1xi1> to vector<8x1xi32>
    %505 = arith.sitofp %504 : vector<8x1xi32> to vector<8x1xf32>
    %506 = vector.broadcast %505 : vector<8x1xf32> to vector<8x32xf32>
    %507 = arith.mulf %501, %506 : vector<8x32xf32>
    %508 = vector.broadcast %12 : vector<1x32xf32> to vector<8x32xf32>
    %509 = arith.mulf %507, %508 : vector<8x32xf32>
    %cst_70 = arith.constant dense<0.000000e+00> : vector<8xf32>
    %510 = vector.multi_reduction <add>, %509, %cst_70 [1] : vector<8x32xf32> to vector<8xf32>
    %511 = vector.shape_cast %510 : vector<8xf32> to vector<8x1xf32>
    %512 = vector.broadcast %13 : vector<1x1xf32> to vector<8x1xf32>
    %513 = arith.addf %511, %512 : vector<8x1xf32>
    %514 = arith.maximumf %468, %513 : vector<8x1xf32>
    %515 = arith.subf %468, %514 : vector<8x1xf32>
    %516 = math.exp %515 : vector<8x1xf32>
    %517 = arith.subf %513, %514 : vector<8x1xf32>
    %518 = math.exp %517 : vector<8x1xf32>
    %519 = arith.mulf %516, %474 : vector<8x1xf32>
    %520 = arith.addf %519, %518 : vector<8x1xf32>
    %521 = vector.broadcast %516 : vector<8x1xf32> to vector<8x32xf32>
    %522 = arith.mulf %521, %479 : vector<8x32xf32>
    %523 = vector.broadcast %518 : vector<8x1xf32> to vector<8x32xf32>
    %524 = arith.mulf %523, %507 : vector<8x32xf32>
    %525 = arith.addf %522, %524 : vector<8x32xf32>
    %526 = vector.extract_strided_slice %10 {offsets = [11, 0, 0], sizes = [1, 8, 128], strides = [1, 1, 1]} : vector<16x8x128xf32> to vector<1x8x128xf32>
    %527 = vector.shape_cast %526 : vector<1x8x128xf32> to vector<8x128xf32>
    %cst_71 = arith.constant dense<0.000000e+00> : vector<8x128xf32>
    %528 = tpu.matmul %501, %11, %cst_71 {dimension_numbers = #tpu.dot_dimension_numbers<[1], [0], [0], [1], [0, 0, 1, 1], [], []>} : vector<8x32xf32>, vector<32x128xf32>, vector<8x128xf32> -> vector<8x128xf32>
    %529 = arith.addf %527, %528 : vector<8x128xf32>
    %530 = arith.negf %529 : vector<8x128xf32>
    %531 = math.exp %530 : vector<8x128xf32>
    %cst_72 = arith.constant 1.000000e+00 : f32
    %532 = vector.broadcast %cst_72 : f32 to vector<8x128xf32>
    %533 = arith.addf %532, %531 : vector<8x128xf32>
    %534 = arith.divf %532, %533 : vector<8x128xf32>
    %535 = vector.extract_strided_slice %534 {offsets = [0, 0], sizes = [8, 32], strides = [1, 1]} : vector<8x128xf32> to vector<8x32xf32>
    %536 = vector.extract_strided_slice %534 {offsets = [0, 32], sizes = [8, 32], strides = [1, 1]} : vector<8x128xf32> to vector<8x32xf32>
    %537 = vector.extract_strided_slice %534 {offsets = [0, 64], sizes = [8, 32], strides = [1, 1]} : vector<8x128xf32> to vector<8x32xf32>
    %cst_73 = arith.constant 2.000000e+00 : f32
    %538 = vector.broadcast %cst_73 : f32 to vector<8x32xf32>
    %539 = arith.mulf %538, %537 : vector<8x32xf32>
    %cst_74 = arith.constant 1.000000e+00 : f32
    %540 = vector.broadcast %cst_74 : f32 to vector<8x32xf32>
    %541 = arith.subf %539, %540 : vector<8x32xf32>
    %542 = vector.extract_strided_slice %534 {offsets = [0, 96], sizes = [8, 32], strides = [1, 1]} : vector<8x128xf32> to vector<8x32xf32>
    %543 = arith.mulf %536, %499 : vector<8x32xf32>
    %544 = arith.mulf %535, %541 : vector<8x32xf32>
    %545 = arith.addf %543, %544 : vector<8x32xf32>
    %546 = math.tanh %545 : vector<8x32xf32>
    %547 = arith.mulf %542, %546 : vector<8x32xf32>
    %c11_i32 = arith.constant 11 : i32
    %548 = vector.broadcast %c11_i32 : i32 to vector<8x1xi32>
    %549 = arith.cmpi sgt, %14, %548 : vector<8x1xi32>
    %550 = arith.extui %549 : vector<8x1xi1> to vector<8x1xi32>
    %551 = arith.sitofp %550 : vector<8x1xi32> to vector<8x1xf32>
    %552 = vector.broadcast %551 : vector<8x1xf32> to vector<8x32xf32>
    %553 = arith.mulf %547, %552 : vector<8x32xf32>
    %554 = vector.broadcast %12 : vector<1x32xf32> to vector<8x32xf32>
    %555 = arith.mulf %553, %554 : vector<8x32xf32>
    %cst_75 = arith.constant dense<0.000000e+00> : vector<8xf32>
    %556 = vector.multi_reduction <add>, %555, %cst_75 [1] : vector<8x32xf32> to vector<8xf32>
    %557 = vector.shape_cast %556 : vector<8xf32> to vector<8x1xf32>
    %558 = vector.broadcast %13 : vector<1x1xf32> to vector<8x1xf32>
    %559 = arith.addf %557, %558 : vector<8x1xf32>
    %560 = arith.maximumf %514, %559 : vector<8x1xf32>
    %561 = arith.subf %514, %560 : vector<8x1xf32>
    %562 = math.exp %561 : vector<8x1xf32>
    %563 = arith.subf %559, %560 : vector<8x1xf32>
    %564 = math.exp %563 : vector<8x1xf32>
    %565 = arith.mulf %562, %520 : vector<8x1xf32>
    %566 = arith.addf %565, %564 : vector<8x1xf32>
    %567 = vector.broadcast %562 : vector<8x1xf32> to vector<8x32xf32>
    %568 = arith.mulf %567, %525 : vector<8x32xf32>
    %569 = vector.broadcast %564 : vector<8x1xf32> to vector<8x32xf32>
    %570 = arith.mulf %569, %553 : vector<8x32xf32>
    %571 = arith.addf %568, %570 : vector<8x32xf32>
    %572 = vector.extract_strided_slice %10 {offsets = [12, 0, 0], sizes = [1, 8, 128], strides = [1, 1, 1]} : vector<16x8x128xf32> to vector<1x8x128xf32>
    %573 = vector.shape_cast %572 : vector<1x8x128xf32> to vector<8x128xf32>
    %cst_76 = arith.constant dense<0.000000e+00> : vector<8x128xf32>
    %574 = tpu.matmul %547, %11, %cst_76 {dimension_numbers = #tpu.dot_dimension_numbers<[1], [0], [0], [1], [0, 0, 1, 1], [], []>} : vector<8x32xf32>, vector<32x128xf32>, vector<8x128xf32> -> vector<8x128xf32>
    %575 = arith.addf %573, %574 : vector<8x128xf32>
    %576 = arith.negf %575 : vector<8x128xf32>
    %577 = math.exp %576 : vector<8x128xf32>
    %cst_77 = arith.constant 1.000000e+00 : f32
    %578 = vector.broadcast %cst_77 : f32 to vector<8x128xf32>
    %579 = arith.addf %578, %577 : vector<8x128xf32>
    %580 = arith.divf %578, %579 : vector<8x128xf32>
    %581 = vector.extract_strided_slice %580 {offsets = [0, 0], sizes = [8, 32], strides = [1, 1]} : vector<8x128xf32> to vector<8x32xf32>
    %582 = vector.extract_strided_slice %580 {offsets = [0, 32], sizes = [8, 32], strides = [1, 1]} : vector<8x128xf32> to vector<8x32xf32>
    %583 = vector.extract_strided_slice %580 {offsets = [0, 64], sizes = [8, 32], strides = [1, 1]} : vector<8x128xf32> to vector<8x32xf32>
    %cst_78 = arith.constant 2.000000e+00 : f32
    %584 = vector.broadcast %cst_78 : f32 to vector<8x32xf32>
    %585 = arith.mulf %584, %583 : vector<8x32xf32>
    %cst_79 = arith.constant 1.000000e+00 : f32
    %586 = vector.broadcast %cst_79 : f32 to vector<8x32xf32>
    %587 = arith.subf %585, %586 : vector<8x32xf32>
    %588 = vector.extract_strided_slice %580 {offsets = [0, 96], sizes = [8, 32], strides = [1, 1]} : vector<8x128xf32> to vector<8x32xf32>
    %589 = arith.mulf %582, %545 : vector<8x32xf32>
    %590 = arith.mulf %581, %587 : vector<8x32xf32>
    %591 = arith.addf %589, %590 : vector<8x32xf32>
    %592 = math.tanh %591 : vector<8x32xf32>
    %593 = arith.mulf %588, %592 : vector<8x32xf32>
    %c12_i32 = arith.constant 12 : i32
    %594 = vector.broadcast %c12_i32 : i32 to vector<8x1xi32>
    %595 = arith.cmpi sgt, %14, %594 : vector<8x1xi32>
    %596 = arith.extui %595 : vector<8x1xi1> to vector<8x1xi32>
    %597 = arith.sitofp %596 : vector<8x1xi32> to vector<8x1xf32>
    %598 = vector.broadcast %597 : vector<8x1xf32> to vector<8x32xf32>
    %599 = arith.mulf %593, %598 : vector<8x32xf32>
    %600 = vector.broadcast %12 : vector<1x32xf32> to vector<8x32xf32>
    %601 = arith.mulf %599, %600 : vector<8x32xf32>
    %cst_80 = arith.constant dense<0.000000e+00> : vector<8xf32>
    %602 = vector.multi_reduction <add>, %601, %cst_80 [1] : vector<8x32xf32> to vector<8xf32>
    %603 = vector.shape_cast %602 : vector<8xf32> to vector<8x1xf32>
    %604 = vector.broadcast %13 : vector<1x1xf32> to vector<8x1xf32>
    %605 = arith.addf %603, %604 : vector<8x1xf32>
    %606 = arith.maximumf %560, %605 : vector<8x1xf32>
    %607 = arith.subf %560, %606 : vector<8x1xf32>
    %608 = math.exp %607 : vector<8x1xf32>
    %609 = arith.subf %605, %606 : vector<8x1xf32>
    %610 = math.exp %609 : vector<8x1xf32>
    %611 = arith.mulf %608, %566 : vector<8x1xf32>
    %612 = arith.addf %611, %610 : vector<8x1xf32>
    %613 = vector.broadcast %608 : vector<8x1xf32> to vector<8x32xf32>
    %614 = arith.mulf %613, %571 : vector<8x32xf32>
    %615 = vector.broadcast %610 : vector<8x1xf32> to vector<8x32xf32>
    %616 = arith.mulf %615, %599 : vector<8x32xf32>
    %617 = arith.addf %614, %616 : vector<8x32xf32>
    %618 = vector.extract_strided_slice %10 {offsets = [13, 0, 0], sizes = [1, 8, 128], strides = [1, 1, 1]} : vector<16x8x128xf32> to vector<1x8x128xf32>
    %619 = vector.shape_cast %618 : vector<1x8x128xf32> to vector<8x128xf32>
    %cst_81 = arith.constant dense<0.000000e+00> : vector<8x128xf32>
    %620 = tpu.matmul %593, %11, %cst_81 {dimension_numbers = #tpu.dot_dimension_numbers<[1], [0], [0], [1], [0, 0, 1, 1], [], []>} : vector<8x32xf32>, vector<32x128xf32>, vector<8x128xf32> -> vector<8x128xf32>
    %621 = arith.addf %619, %620 : vector<8x128xf32>
    %622 = arith.negf %621 : vector<8x128xf32>
    %623 = math.exp %622 : vector<8x128xf32>
    %cst_82 = arith.constant 1.000000e+00 : f32
    %624 = vector.broadcast %cst_82 : f32 to vector<8x128xf32>
    %625 = arith.addf %624, %623 : vector<8x128xf32>
    %626 = arith.divf %624, %625 : vector<8x128xf32>
    %627 = vector.extract_strided_slice %626 {offsets = [0, 0], sizes = [8, 32], strides = [1, 1]} : vector<8x128xf32> to vector<8x32xf32>
    %628 = vector.extract_strided_slice %626 {offsets = [0, 32], sizes = [8, 32], strides = [1, 1]} : vector<8x128xf32> to vector<8x32xf32>
    %629 = vector.extract_strided_slice %626 {offsets = [0, 64], sizes = [8, 32], strides = [1, 1]} : vector<8x128xf32> to vector<8x32xf32>
    %cst_83 = arith.constant 2.000000e+00 : f32
    %630 = vector.broadcast %cst_83 : f32 to vector<8x32xf32>
    %631 = arith.mulf %630, %629 : vector<8x32xf32>
    %cst_84 = arith.constant 1.000000e+00 : f32
    %632 = vector.broadcast %cst_84 : f32 to vector<8x32xf32>
    %633 = arith.subf %631, %632 : vector<8x32xf32>
    %634 = vector.extract_strided_slice %626 {offsets = [0, 96], sizes = [8, 32], strides = [1, 1]} : vector<8x128xf32> to vector<8x32xf32>
    %635 = arith.mulf %628, %591 : vector<8x32xf32>
    %636 = arith.mulf %627, %633 : vector<8x32xf32>
    %637 = arith.addf %635, %636 : vector<8x32xf32>
    %638 = math.tanh %637 : vector<8x32xf32>
    %639 = arith.mulf %634, %638 : vector<8x32xf32>
    %c13_i32 = arith.constant 13 : i32
    %640 = vector.broadcast %c13_i32 : i32 to vector<8x1xi32>
    %641 = arith.cmpi sgt, %14, %640 : vector<8x1xi32>
    %642 = arith.extui %641 : vector<8x1xi1> to vector<8x1xi32>
    %643 = arith.sitofp %642 : vector<8x1xi32> to vector<8x1xf32>
    %644 = vector.broadcast %643 : vector<8x1xf32> to vector<8x32xf32>
    %645 = arith.mulf %639, %644 : vector<8x32xf32>
    %646 = vector.broadcast %12 : vector<1x32xf32> to vector<8x32xf32>
    %647 = arith.mulf %645, %646 : vector<8x32xf32>
    %cst_85 = arith.constant dense<0.000000e+00> : vector<8xf32>
    %648 = vector.multi_reduction <add>, %647, %cst_85 [1] : vector<8x32xf32> to vector<8xf32>
    %649 = vector.shape_cast %648 : vector<8xf32> to vector<8x1xf32>
    %650 = vector.broadcast %13 : vector<1x1xf32> to vector<8x1xf32>
    %651 = arith.addf %649, %650 : vector<8x1xf32>
    %652 = arith.maximumf %606, %651 : vector<8x1xf32>
    %653 = arith.subf %606, %652 : vector<8x1xf32>
    %654 = math.exp %653 : vector<8x1xf32>
    %655 = arith.subf %651, %652 : vector<8x1xf32>
    %656 = math.exp %655 : vector<8x1xf32>
    %657 = arith.mulf %654, %612 : vector<8x1xf32>
    %658 = arith.addf %657, %656 : vector<8x1xf32>
    %659 = vector.broadcast %654 : vector<8x1xf32> to vector<8x32xf32>
    %660 = arith.mulf %659, %617 : vector<8x32xf32>
    %661 = vector.broadcast %656 : vector<8x1xf32> to vector<8x32xf32>
    %662 = arith.mulf %661, %645 : vector<8x32xf32>
    %663 = arith.addf %660, %662 : vector<8x32xf32>
    %664 = vector.extract_strided_slice %10 {offsets = [14, 0, 0], sizes = [1, 8, 128], strides = [1, 1, 1]} : vector<16x8x128xf32> to vector<1x8x128xf32>
    %665 = vector.shape_cast %664 : vector<1x8x128xf32> to vector<8x128xf32>
    %cst_86 = arith.constant dense<0.000000e+00> : vector<8x128xf32>
    %666 = tpu.matmul %639, %11, %cst_86 {dimension_numbers = #tpu.dot_dimension_numbers<[1], [0], [0], [1], [0, 0, 1, 1], [], []>} : vector<8x32xf32>, vector<32x128xf32>, vector<8x128xf32> -> vector<8x128xf32>
    %667 = arith.addf %665, %666 : vector<8x128xf32>
    %668 = arith.negf %667 : vector<8x128xf32>
    %669 = math.exp %668 : vector<8x128xf32>
    %cst_87 = arith.constant 1.000000e+00 : f32
    %670 = vector.broadcast %cst_87 : f32 to vector<8x128xf32>
    %671 = arith.addf %670, %669 : vector<8x128xf32>
    %672 = arith.divf %670, %671 : vector<8x128xf32>
    %673 = vector.extract_strided_slice %672 {offsets = [0, 0], sizes = [8, 32], strides = [1, 1]} : vector<8x128xf32> to vector<8x32xf32>
    %674 = vector.extract_strided_slice %672 {offsets = [0, 32], sizes = [8, 32], strides = [1, 1]} : vector<8x128xf32> to vector<8x32xf32>
    %675 = vector.extract_strided_slice %672 {offsets = [0, 64], sizes = [8, 32], strides = [1, 1]} : vector<8x128xf32> to vector<8x32xf32>
    %cst_88 = arith.constant 2.000000e+00 : f32
    %676 = vector.broadcast %cst_88 : f32 to vector<8x32xf32>
    %677 = arith.mulf %676, %675 : vector<8x32xf32>
    %cst_89 = arith.constant 1.000000e+00 : f32
    %678 = vector.broadcast %cst_89 : f32 to vector<8x32xf32>
    %679 = arith.subf %677, %678 : vector<8x32xf32>
    %680 = vector.extract_strided_slice %672 {offsets = [0, 96], sizes = [8, 32], strides = [1, 1]} : vector<8x128xf32> to vector<8x32xf32>
    %681 = arith.mulf %674, %637 : vector<8x32xf32>
    %682 = arith.mulf %673, %679 : vector<8x32xf32>
    %683 = arith.addf %681, %682 : vector<8x32xf32>
    %684 = math.tanh %683 : vector<8x32xf32>
    %685 = arith.mulf %680, %684 : vector<8x32xf32>
    %c14_i32 = arith.constant 14 : i32
    %686 = vector.broadcast %c14_i32 : i32 to vector<8x1xi32>
    %687 = arith.cmpi sgt, %14, %686 : vector<8x1xi32>
    %688 = arith.extui %687 : vector<8x1xi1> to vector<8x1xi32>
    %689 = arith.sitofp %688 : vector<8x1xi32> to vector<8x1xf32>
    %690 = vector.broadcast %689 : vector<8x1xf32> to vector<8x32xf32>
    %691 = arith.mulf %685, %690 : vector<8x32xf32>
    %692 = vector.broadcast %12 : vector<1x32xf32> to vector<8x32xf32>
    %693 = arith.mulf %691, %692 : vector<8x32xf32>
    %cst_90 = arith.constant dense<0.000000e+00> : vector<8xf32>
    %694 = vector.multi_reduction <add>, %693, %cst_90 [1] : vector<8x32xf32> to vector<8xf32>
    %695 = vector.shape_cast %694 : vector<8xf32> to vector<8x1xf32>
    %696 = vector.broadcast %13 : vector<1x1xf32> to vector<8x1xf32>
    %697 = arith.addf %695, %696 : vector<8x1xf32>
    %698 = arith.maximumf %652, %697 : vector<8x1xf32>
    %699 = arith.subf %652, %698 : vector<8x1xf32>
    %700 = math.exp %699 : vector<8x1xf32>
    %701 = arith.subf %697, %698 : vector<8x1xf32>
    %702 = math.exp %701 : vector<8x1xf32>
    %703 = arith.mulf %700, %658 : vector<8x1xf32>
    %704 = arith.addf %703, %702 : vector<8x1xf32>
    %705 = vector.broadcast %700 : vector<8x1xf32> to vector<8x32xf32>
    %706 = arith.mulf %705, %663 : vector<8x32xf32>
    %707 = vector.broadcast %702 : vector<8x1xf32> to vector<8x32xf32>
    %708 = arith.mulf %707, %691 : vector<8x32xf32>
    %709 = arith.addf %706, %708 : vector<8x32xf32>
    %710 = vector.extract_strided_slice %10 {offsets = [15, 0, 0], sizes = [1, 8, 128], strides = [1, 1, 1]} : vector<16x8x128xf32> to vector<1x8x128xf32>
    %711 = vector.shape_cast %710 : vector<1x8x128xf32> to vector<8x128xf32>
    %cst_91 = arith.constant dense<0.000000e+00> : vector<8x128xf32>
    %712 = tpu.matmul %685, %11, %cst_91 {dimension_numbers = #tpu.dot_dimension_numbers<[1], [0], [0], [1], [0, 0, 1, 1], [], []>} : vector<8x32xf32>, vector<32x128xf32>, vector<8x128xf32> -> vector<8x128xf32>
    %713 = arith.addf %711, %712 : vector<8x128xf32>
    %714 = arith.negf %713 : vector<8x128xf32>
    %715 = math.exp %714 : vector<8x128xf32>
    %cst_92 = arith.constant 1.000000e+00 : f32
    %716 = vector.broadcast %cst_92 : f32 to vector<8x128xf32>
    %717 = arith.addf %716, %715 : vector<8x128xf32>
    %718 = arith.divf %716, %717 : vector<8x128xf32>
    %719 = vector.extract_strided_slice %718 {offsets = [0, 0], sizes = [8, 32], strides = [1, 1]} : vector<8x128xf32> to vector<8x32xf32>
    %720 = vector.extract_strided_slice %718 {offsets = [0, 32], sizes = [8, 32], strides = [1, 1]} : vector<8x128xf32> to vector<8x32xf32>
    %721 = vector.extract_strided_slice %718 {offsets = [0, 64], sizes = [8, 32], strides = [1, 1]} : vector<8x128xf32> to vector<8x32xf32>
    %cst_93 = arith.constant 2.000000e+00 : f32
    %722 = vector.broadcast %cst_93 : f32 to vector<8x32xf32>
    %723 = arith.mulf %722, %721 : vector<8x32xf32>
    %cst_94 = arith.constant 1.000000e+00 : f32
    %724 = vector.broadcast %cst_94 : f32 to vector<8x32xf32>
    %725 = arith.subf %723, %724 : vector<8x32xf32>
    %726 = vector.extract_strided_slice %718 {offsets = [0, 96], sizes = [8, 32], strides = [1, 1]} : vector<8x128xf32> to vector<8x32xf32>
    %727 = arith.mulf %720, %683 : vector<8x32xf32>
    %728 = arith.mulf %719, %725 : vector<8x32xf32>
    %729 = arith.addf %727, %728 : vector<8x32xf32>
    %730 = math.tanh %729 : vector<8x32xf32>
    %731 = arith.mulf %726, %730 : vector<8x32xf32>
    %c15_i32 = arith.constant 15 : i32
    %732 = vector.broadcast %c15_i32 : i32 to vector<8x1xi32>
    %733 = arith.cmpi sgt, %14, %732 : vector<8x1xi32>
    %734 = arith.extui %733 : vector<8x1xi1> to vector<8x1xi32>
    %735 = arith.sitofp %734 : vector<8x1xi32> to vector<8x1xf32>
    %736 = vector.broadcast %735 : vector<8x1xf32> to vector<8x32xf32>
    %737 = arith.mulf %731, %736 : vector<8x32xf32>
    %738 = vector.broadcast %12 : vector<1x32xf32> to vector<8x32xf32>
    %739 = arith.mulf %737, %738 : vector<8x32xf32>
    %cst_95 = arith.constant dense<0.000000e+00> : vector<8xf32>
    %740 = vector.multi_reduction <add>, %739, %cst_95 [1] : vector<8x32xf32> to vector<8xf32>
    %741 = vector.shape_cast %740 : vector<8xf32> to vector<8x1xf32>
    %742 = vector.broadcast %13 : vector<1x1xf32> to vector<8x1xf32>
    %743 = arith.addf %741, %742 : vector<8x1xf32>
    %744 = arith.maximumf %698, %743 : vector<8x1xf32>
    %745 = arith.subf %698, %744 : vector<8x1xf32>
    %746 = math.exp %745 : vector<8x1xf32>
    %747 = arith.subf %743, %744 : vector<8x1xf32>
    %748 = math.exp %747 : vector<8x1xf32>
    %749 = arith.mulf %746, %704 : vector<8x1xf32>
    %750 = arith.addf %749, %748 : vector<8x1xf32>
    %751 = vector.broadcast %746 : vector<8x1xf32> to vector<8x32xf32>
    %752 = arith.mulf %751, %709 : vector<8x32xf32>
    %753 = vector.broadcast %748 : vector<8x1xf32> to vector<8x32xf32>
    %754 = arith.mulf %753, %737 : vector<8x32xf32>
    %755 = arith.addf %752, %754 : vector<8x32xf32>
    %756 = vector.broadcast %750 : vector<8x1xf32> to vector<8x32xf32>
    %757 = arith.divf %755, %756 : vector<8x32xf32>
    %c0_96 = arith.constant 0 : index
    %c0_97 = arith.constant 0 : index
    %758 = vector.load %arg6[%c0_96, %c0_97] : memref<32x4xf32, #tpu.memory_space<vmem>>, vector<32x4xf32>
    %cst_98 = arith.constant dense<0.000000e+00> : vector<8x4xf32>
    %759 = tpu.matmul %757, %758, %cst_98 {dimension_numbers = #tpu.dot_dimension_numbers<[1], [0], [0], [1], [0, 0, 1, 1], [], []>} : vector<8x32xf32>, vector<32x4xf32>, vector<8x4xf32> -> vector<8x4xf32>
    %c0_99 = arith.constant 0 : index
    %c0_100 = arith.constant 0 : index
    %760 = vector.load %arg7[%c0_99, %c0_100] : memref<1x4xf32, #tpu.memory_space<vmem>>, vector<1x4xf32>
    %761 = vector.broadcast %760 : vector<1x4xf32> to vector<8x4xf32>
    %762 = arith.addf %759, %761 : vector<8x4xf32>
    %c0_101 = arith.constant 0 : index
    %c0_102 = arith.constant 0 : index
    %763 = vector.load %arg8[%c0_101, %c0_102] : memref<8x4xf32, #tpu.memory_space<vmem>>, vector<8x4xf32>
    tpu.vector_store %arg8[%c0_101, %c0_102], %762 {strides = array<i32>} : memref<8x4xf32, #tpu.memory_space<vmem>>, vector<8x4xf32>,
    return
  }
}

</mosaic_0001>

<bundles_post_ra>
// kernel: lstm_with_attention.1
= control target key start
LH: loop header
LB: loop body
LE: loop exit
PB: predicated region body
PF: predicated region fallthrough
CT: control target
= control target key end

     0   :  { %s4232_s0 = inlined_call_operand.vmem [shape: s32[16,8], index: 0, kind: input, shape index: {}]   ;;  %s4233_s1 = inlined_call_operand.vmem [shape: s32[8,1], index: 1, kind: input, shape index: {}]   ;;  %s4234_s2 = inlined_call_operand.hbm [shape: f32[128,128], index: 2, kind: input, shape index: {}]   ;;  %s4235_s3 = inlined_call_operand.vmem [shape: f32[32,128], index: 3, kind: input, shape index: {}]   ;;  %s4236_s4 = inlined_call_operand.vmem [shape: f32[1,32], index: 4, kind: input, shape index: {}]   ;;  %s4237_s5 = inlined_call_operand.<no memory space> [shape: f32[1,1], index: 5, kind: input, shape index: {}]   ;;  %s4238_s6 = inlined_call_operand.vmem [shape: f32[32,4], index: 6, kind: input, shape index: {}]   ;;  %s4239_s7 = inlined_call_operand.vmem [shape: f32[1,4], index: 7, kind: input, shape index: {}]   ;;  %s4240_s8 = inlined_call_operand.vmem [shape: f32[8,4], index: 8, kind: output, shape index: {}]  }
   0x1   :  { %v13_v0 = vstv %s4237_s5 }
   0x2   :  { %14 = vst [vmem:[#allocation2] sm:$0x1] %v13_v0 }
   0x3   :  { %15 = vsyncpa [#allocation4], 0  ;;  %s3547_s29 = smov [#allocation3]   ;;  %s3523_s11 = scalar_lea.hbm %s4234_s2, 2048 }
   0x4   :  { %s25_s30 = sshll.u32 %s3547_s29, 4  ;;  %p3524_p0 = scmp.ne.s32.totalorder %s4234_s2, %s3523_s11  ;;  %s26_s30 = int_to_ptr.vmem [resolvable:$true] %s25_s30 }
   0x5   :  { %p3527_p1 = scmp.lt.u32.totalorder %s3523_s11, %s4234_s2 }
   0x7   :  { %p3529_p2 = pnand %p3527_p1, %p3524_p0 }
   0x9   :  { %3532 = shalt.err (!%p3529_p2)
}
   0xa   :  { %s3533_s5 = scalar_lea.vmem %s26_s30, 2048  ;;  %p3538_p4 = scmp.lt.s32.totalorder %s26_s30, %s26_s30 }
   0xb   :  { %p3534_p3 = scmp.ne.s32.totalorder %s26_s30, %s3533_s5  ;;  %p3539_p5 = scmp.lt.s32.totalorder %s3533_s5, %s3533_s5 }
   0xd   :  { %p3540_p6 = por %p3539_p5, %p3538_p4 }
   0xf   :  { %p3541_p7 = pnand %p3540_p6, %p3534_p3 }
  0x11   :  { %3544 = shalt.err (!%p3541_p7)
}
  0x12   :  { %s3548_s16 = smov 128   ;;  %s3549_s17 = smov 8  }
  0x13   :  { %31 = dma.hbm_to_vmem [thread:$0]  %s4234_s2, 2048, %s26_s30, [#allocation4], %s3548_s16, %s3548_s16, %s3549_s17  }
  0x14   :  { %3545 = dma.done.wait [#allocation4], 2048  }
  0x15   :  { %3546 = vsyncadd [#allocation4], 4294965248  ;;  %v47_v1 = vlaneseq  ;;  %v3550_v2 = vmov 0.0|0.0   ;;  %vm3551_vm0 = vmmov 0   ;;  %v3552_v4 = vmov 0.0   ;;  %v3629_v7 = vld [vmem:[%s4232_s0] sm:$0xff] }
  0x16   :  { %3236 = vmatprep.subr.bf16.mxu1 %v3550_v2  ;;  %3025 = vmatprep.mubr.msk.f32.mxu1 %vm3551_vm0, %v3552_v4  ;;  %v209_v8 = vld [vmem:[#allocation3] sm:$0xff]  ;;  %v210_v9 = vld [vmem:[#allocation3 + $0x8] sm:$0xff]  ;;  %v211_v12 = vld [vmem:[#allocation3 + $0x10] sm:$0xff]  ;;  %v3553_v42 = vmov 1.0   ;;  %s3555_s29 = smov 32   ;;  %vm377_vm3 = vcmask 261120  }
  0x17   :  { %v3620_v3 = vshrl.u32 %v47_v1, 7  ;;  %v3204_v11 = vpack.c.bf16 %v210_v9, %v209_v8  ;;  %v212_v13 = vld [vmem:[#allocation3 + $0x18] sm:$0xff]  ;;  %v213_v15 = vld [vmem:[#allocation3 + $0x20] sm:$0xff]  ;;  %v214_v16 = vld [vmem:[#allocation3 + $0x28] sm:$0xff]  ;;  %v3666_v40 = vand.u32 127, %v47_v1  ;;  %s3557_s12 = smov 96  }
  0x18   :  { %v3208_v14 = vpack.c.bf16 %v212_v13, %v211_v12  ;;  %v3212_v18 = vpack.c.bf16 %v214_v16, %v213_v15  ;;  %v215_v19 = vld [vmem:[#allocation3 + $0x30] sm:$0xff]  ;;  %v370_v20 = vld [vmem:[%s4235_s3] sm:$0xff]  ;;  %v371_v21 = vld [vmem:[%s4235_s3 + $0x8] sm:$0xff] }
  0x19   :  { %v51_v5 = vsub.s32 0, %v3620_v3  ;;  %v58_v6 = vsub.s32 1, %v3620_v3  ;;  %3205 = vmatprep.subr.bf16.mxu0 %v3204_v11  ;;  %v216_v22 = vld [vmem:[#allocation3 + $0x38] sm:$0xff]  ;;  %v3643_v23 = vpack.c.bf16 %v371_v21, %v370_v20  ;;  %v372_v24 = vld [vmem:[%s4235_s3 + $0x10] sm:$0xff]  ;;  %v217_v28 = vld [vmem:[#allocation3 + $0x40] sm:$0xff] }
  0x1a   :  { %3207 = vmatpush3.bf16.msra.mxu0 %v3204_v11  ;;  %v373_v25 = vld [vmem:[%s4235_s3 + $0x18] sm:$0xff]  ;;  %v3216_v27 = vpack.c.bf16 %v216_v22, %v215_v19  ;;  %v218_v29 = vld [vmem:[#allocation3 + $0x48] sm:$0xff]  ;;  %v221_v34 = vld [vmem:[#allocation3 + $0x60] sm:$0xff]  ;;  %s3554_s3 = smov 64  }
  0x1b   :  { %v52_v10 = vrot.slane %v3629_v7, %v51_v5  ;;  %v59_v17 = vrot.slane %v3629_v7, %v58_v6  ;;  %3209 = vmatprep.subr.bf16.mxu0 %v3208_v14  ;;  %3238 = vmatpush3.bf16.msra.mxu1 %v3643_v23  ;;  %v3652_v26 = vpack.c.bf16 %v373_v25, %v372_v24  ;;  %v219_v31 = vld [vmem:[#allocation3 + $0x50] sm:$0xff]  ;;  %v220_v32 = vld [vmem:[#allocation3 + $0x58] sm:$0xff]  ;;  %v222_v35 = vld [vmem:[#allocation3 + $0x68] sm:$0xff]  ;;  %v72_v24 = vsub.s32 3, %v3620_v3 }
  0x1c   :  { %3239 = vmatprep.subr.bf16.mxu1 %v3550_v2  ;;  %v3220_v30 = vpack.c.bf16 %v218_v29, %v217_v28  ;;  %v3224_v33 = vpack.c.bf16 %v220_v32, %v219_v31  ;;  %v3228_v36 = vpack.c.bf16 %v222_v35, %v221_v34  ;;  %v223_v37 = vld [vmem:[#allocation3 + $0x70] sm:$0xff]  ;;  %v224_v38 = vld [vmem:[#allocation3 + $0x78] sm:$0xff] }
  0x1d   :  { %54 = vbcast.lane.b32.xlu0 %v52_v10, 256  ;;  %v3232_v39 = vpack.c.bf16 %v224_v38, %v223_v37 }
  0x1e   :  { %3211 = vmatpush3.bf16.msra.mxu0 %v3208_v14 }
  0x1f   :  { %3213 = vmatprep.subr.bf16.mxu0 %v3212_v18  ;;  %3241 = vmatpush3.bf16.msra.mxu1 %v3652_v26 }
  0x20   :  { %3242 = vmatprep.subr.bf16.mxu1 %v3550_v2 }
  0x21   :  { %61 = vbcast.lane.b32.xlu0 %v59_v17, 256  ;;  %v65_v17 = vsub.s32 2, %v3620_v3 }
  0x22   :  { %3215 = vmatpush3.bf16.msra.mxu0 %v3212_v18  ;;  %3026 = vmatmul.mubr.f32.vlgmr.msra.gmra.mrb[0].mxu1 %v3552_v4 }
  0x23   :  { %3217 = vmatprep.subr.bf16.mxu0 %v3216_v27  ;;  %3244 = vmatpush3.bf16.msra.mxu1 %v3643_v23  ;;  %v66_v18 = vrot.slane %v3629_v7, %v65_v17 }
  0x24   :  { %3245 = vmatprep.subr.bf16.mxu1 %v3550_v2  ;;  %3036 = vmatprep.mubr.msk.f32.mxu1 %vm3551_vm0, %v3552_v4 }
  0x26   :  { %3219 = vmatpush3.bf16.msra.mxu0 %v3216_v27  ;;  %v73_v27 = vrot.slane %v3629_v7, %v72_v24 }
  0x27   :  { %3221 = vmatprep.subr.bf16.mxu0 %v3220_v30  ;;  %3247 = vmatpush3.bf16.msra.mxu1 %v3652_v26 }
  0x28   :  { %3248 = vmatprep.subr.bf16.mxu1 %v3550_v2 }
  0x2a   :  { %3223 = vmatpush3.bf16.msra.mxu0 %v3220_v30 }
  0x2b   :  { %3225 = vmatprep.subr.bf16.mxu0 %v3224_v33 }
  0x2e   :  { %3227 = vmatpush3.bf16.msra.mxu0 %v3224_v33 }
  0x2f   :  { %3229 = vmatprep.subr.bf16.mxu0 %v3228_v36 }
  0x32   :  { %3231 = vmatpush3.bf16.msra.mxu0 %v3228_v36 }
  0x33   :  { %3233 = vmatprep.subr.bf16.mxu0 %v3232_v39 }
  0x36   :  { %3235 = vmatpush3.bf16.msra.mxu0 %v3232_v39 }
  0x37   :  { %3278 = vmatprep.subr.bf16.mxu0 %v3550_v2 }
  0x8f   :  { %v55_v41 = vpop.permute.xlu0 %54 }
  0x90   :  { %vm161_vm1 = vcmp.eq.s32.totalorder %v3666_v40, %v55_v41 }
  0x91   :  { %2993 = vmatprep.mubr.msk.f32.mxu0 %vm161_vm1, %v3553_v42 }
  0x93   :  { %v62_v43 = vpop.permute.xlu0 %61 }
  0x94   :  { %vm162_vm2 = vcmp.eq.s32.totalorder %v3666_v40, %v62_v43 }
  0x95   :  { %2994 = vmatmul.mubr.msk.f32.vlgmr.msra.gmra.mrb[0].mxu0 %vm162_vm2, %v3553_v42 }
  0x96   :  { %3280 = vmatpush3.bf16.msra.mxu0 %v3643_v23 }
  0x97   :  { %3281 = vmatprep.subr.bf16.mxu0 %v3550_v2 }
  0x9a   :  { %3283 = vmatpush3.bf16.msra.mxu0 %v3652_v26 }
  0x9b   :  { %3290 = vmatprep.subr.bf16.mxu0 %v3550_v2 }
  0xf5   :  { %v447_v44 = vpop.f32.mrb[0].mxu1 }
  0xf6   :  { %v3027_v45 = vpop.f32.mrb[1].mxu1 }
 0x168   :  { %v2995_v46 = vpop.f32.mrb[0].mxu0 }
 0x169   :  { %v291_v47 = vpop.f32.mrb[1].mxu0 }
 0x16a   :  { %v451_v48 = vadd.f32 %v447_v44, %v291_v47 }
 0x16c   :  { %v2777_v49 = vmul.f32 -1.442695, %v451_v48 }
 0x16e   :  { %3361 = vpow2.f32 %v2777_v49 }
 0x178   :  { %v3362_v50 = vpop.eup %3361 }
 0x179   :  { %v455_v51 = vadd.f32 1.0, %v3362_v50 }
 0x17b   :  { %3363 = vrcp.f32 %v455_v51 }
 0x185   :  { %v3364_v52 = vpop.eup %3363 }
 0x186   :  { %v458_v53 = vmul.f32 2.0, %v3364_v52  ;;  %v460_v57 = vmul.f32 0.0, %v3364_v52 }
 0x188   :  { %v2778_v54 = vadd.f32 -1.0, %v458_v53 }
 0x18a   :  { %462 = vrot.lane.b32.xlu1 %v2778_v54, %s3554_s3 }
 0x1fc   :  { %v463_v55 = vpop.permute.xlu1 %462 }
 0x1fd   :  { %v465_v56 = vmul.f32 %v3364_v52, %v463_v55 }
 0x1ff   :  { %467 = vrot.lane.b32.xlu1 %v465_v56, %s3555_s29 }
 0x271   :  { %v468_v58 = vpop.permute.xlu1 %467 }
 0x272   :  { %v470_v59 = vadd.f32 %v468_v58, %v460_v57 }
 0x274   :  { %3365 = vtanh.f32 %v470_v59 }
 0x27e   :  { %v3366_v60 = vpop.eup %3365 }
 0x27f   :  { %473 = vrot.lane.b32.xlu0 %v3366_v60, %s3554_s3 }
 0x2f1   :  { %v474_v61 = vpop.permute.xlu0 %473 }
 0x2f2   :  { %v3679_v62 = vmul.f32 %v3364_v52, %v474_v61 }
 0x2f4   :  { %531 = vrot.lane.b32.xlu1 %v3679_v62, %s3555_s29 }
 0x366   :  { %v532_v63 = vpop.permute.xlu1 %531 }
 0x367   :  { %3037 = vmatmul.mubr.msk.f32.vlgmr.msra.gmra.mrb[2].mxu1 %vm377_vm3, %v532_v63 }
 0x368   :  { %3250 = vmatpush3.bf16.msra.mxu1 %v3643_v23  ;;  %3047 = vmatprep.mubr.msk.f32.mxu1 %vm3551_vm0, %v3552_v4 }
 0x369   :  { %3251 = vmatprep.subr.bf16.mxu1 %v3550_v2 }
 0x36c   :  { %3253 = vmatpush3.bf16.msra.mxu1 %v3652_v26 }
 0x36d   :  { %3254 = vmatprep.subr.bf16.mxu1 %v3550_v2 }
 0x43a   :  { %v601_v0 = vpop.f32.mrb[2].mxu1 }
 0x43b   :  { %v605_v1 = vadd.f32 %v2995_v46, %v601_v0  ;;  %v3038_v8 = vpop.f32.mrb[3].mxu1 }
 0x43c   :  { %v79_v8 = vsub.s32 4, %v3620_v3 }
 0x43d   :  { %v2783_v9 = vmul.f32 -1.442695, %v605_v1 }
 0x43f   :  { %3367 = vpow2.f32 %v2783_v9  ;;  %v80_v9 = vrot.slane %v3629_v7, %v79_v8 }
 0x449   :  { %v3368_v10 = vpop.eup %3367 }
 0x44a   :  { %v609_v11 = vadd.f32 1.0, %v3368_v10 }
 0x44c   :  { %3369 = vrcp.f32 %v609_v11 }
 0x456   :  { %v3370_v12 = vpop.eup %3369 }
 0x457   :  { %v612_v13 = vmul.f32 2.0, %v3370_v12  ;;  %v614_v19 = vmul.f32 %v3370_v12, %v470_v59 }
 0x459   :  { %v2784_v14 = vadd.f32 -1.0, %v612_v13 }
 0x45b   :  { %616 = vrot.lane.b32.xlu0 %v2784_v14, %s3554_s3  ;;  %v86_v14 = vsub.s32 5, %v3620_v3 }
 0x4cd   :  { %v617_v15 = vpop.permute.xlu0 %616 }
 0x4ce   :  { %v619_v16 = vmul.f32 %v3370_v12, %v617_v15 }
 0x4d0   :  { %621 = vrot.lane.b32.xlu1 %v619_v16, %s3555_s29  ;;  %v87_v16 = vrot.slane %v3629_v7, %v86_v14 }
 0x4d4   :  { %68 = vbcast.lane.b32.xlu1 %v66_v18, 256 }
 0x542   :  { %v622_v20 = vpop.permute.xlu1 %621 }
 0x543   :  { %v624_v21 = vadd.f32 %v622_v20, %v614_v19 }
 0x545   :  { %3371 = vtanh.f32 %v624_v21 }
 0x546   :  { %v69_v22 = vpop.permute.xlu1 %68 }
 0x547   :  { %vm163_vm4 = vcmp.eq.s32.totalorder %v3666_v40, %v69_v22 }
 0x548   :  { %2996 = vmatprep.mubr.msk.f32.mxu0 %vm163_vm4, %v3553_v42 }
 0x54f   :  { %v3372_v25 = vpop.eup %3371 }
 0x550   :  { %627 = vrot.lane.b32.xlu0 %v3372_v25, %s3554_s3 }
 0x554   :  { %75 = vbcast.lane.b32.xlu0 %v73_v27, 256 }
 0x5c2   :  { %v628_v28 = vpop.permute.xlu0 %627 }
 0x5c3   :  { %v3703_v29 = vmul.f32 %v3370_v12, %v628_v28 }
 0x5c5   :  { %672 = vrot.lane.b32.xlu1 %v3703_v29, %s3555_s29 }
 0x5c6   :  { %v76_v30 = vpop.permute.xlu0 %75 }
 0x5c7   :  { %vm164_vm5 = vcmp.eq.s32.totalorder %v3666_v40, %v76_v30 }
 0x5c8   :  { %2997 = vmatmul.mubr.msk.f32.gmra.mrb[2].mxu0 %vm164_vm5, %v3553_v42 }
 0x637   :  { %v673_v31 = vpop.permute.xlu1 %672 }
 0x638   :  { %3048 = vmatmul.mubr.msk.f32.vlgmr.msra.gmra.mrb[4].mxu1 %vm377_vm3, %v673_v31 }
 0x639   :  { %3256 = vmatpush3.bf16.msra.mxu1 %v3643_v23  ;;  %3058 = vmatprep.mubr.msk.f32.mxu1 %vm3551_vm0, %v3552_v4 }
 0x63a   :  { %3257 = vmatprep.subr.bf16.mxu1 %v3550_v2 }
 0x63d   :  { %3259 = vmatpush3.bf16.msra.mxu1 %v3652_v26 }
 0x63e   :  { %3260 = vmatprep.subr.bf16.mxu1 %v3550_v2 }
 0x69b   :  { %v2998_v32 = vpop.f32.mrb[2].mxu0 }
 0x69c   :  { %v301_v33 = vpop.f32.mrb[3].mxu0 }
 0x70b   :  { %v742_v34 = vpop.f32.mrb[4].mxu1 }
 0x70c   :  { %v746_v35 = vadd.f32 %v742_v34, %v301_v33  ;;  %v3049_v36 = vpop.f32.mrb[5].mxu1 }
 0x70e   :  { %v2787_v37 = vmul.f32 -1.442695, %v746_v35 }
 0x710   :  { %3373 = vpow2.f32 %v2787_v37 }
 0x71a   :  { %v3374_v38 = vpop.eup %3373 }
 0x71b   :  { %v750_v39 = vadd.f32 1.0, %v3374_v38 }
 0x71d   :  { %3375 = vrcp.f32 %v750_v39 }
 0x727   :  { %v3376_v41 = vpop.eup %3375 }
 0x728   :  { %v753_v43 = vmul.f32 2.0, %v3376_v41  ;;  %v755_v47 = vmul.f32 %v3376_v41, %v624_v21 }
 0x72a   :  { %v2788_v44 = vadd.f32 -1.0, %v753_v43 }
 0x72c   :  { %757 = vrot.lane.b32.xlu0 %v2788_v44, %s3554_s3 }
 0x79e   :  { %v758_v45 = vpop.permute.xlu0 %757 }
 0x79f   :  { %v760_v46 = vmul.f32 %v3376_v41, %v758_v45 }
 0x7a1   :  { %762 = vrot.lane.b32.xlu1 %v760_v46, %s3555_s29 }
 0x813   :  { %v763_v48 = vpop.permute.xlu1 %762 }
 0x814   :  { %v765_v49 = vadd.f32 %v763_v48, %v755_v47 }
 0x816   :  { %3377 = vtanh.f32 %v765_v49 }
 0x820   :  { %v3378_v50 = vpop.eup %3377 }
 0x821   :  { %768 = vrot.lane.b32.xlu0 %v3378_v50, %s3554_s3 }
 0x893   :  { %v769_v51 = vpop.permute.xlu0 %768 }
 0x894   :  { %v3719_v52 = vmul.f32 %v3376_v41, %v769_v51 }
 0x896   :  { %813 = vrot.lane.b32.xlu1 %v3719_v52, %s3555_s29 }
 0x908   :  { %v814_v53 = vpop.permute.xlu1 %813 }
 0x909   :  { %3059 = vmatmul.mubr.msk.f32.vlgmr.msra.gmra.mrb[6].mxu1 %vm377_vm3, %v814_v53 }
 0x90a   :  { %3262 = vmatpush3.bf16.msra.mxu1 %v3643_v23  ;;  %3069 = vmatprep.mubr.msk.f32.mxu1 %vm3551_vm0, %v3552_v4 }
 0x90b   :  { %3263 = vmatprep.subr.bf16.mxu1 %v3550_v2 }
 0x90e   :  { %3265 = vmatpush3.bf16.msra.mxu1 %v3652_v26 }
 0x90f   :  { %3266 = vmatprep.subr.bf16.mxu1 %v3550_v2 }
 0x9dc   :  { %v883_v54 = vpop.f32.mrb[6].mxu1 }
 0x9dd   :  { %v887_v55 = vadd.f32 %v2998_v32, %v883_v54  ;;  %v3060_v56 = vpop.f32.mrb[7].mxu1 }
 0x9df   :  { %v2791_v57 = vmul.f32 -1.442695, %v887_v55 }
 0x9e1   :  { %3379 = vpow2.f32 %v2791_v57 }
 0x9eb   :  { %v3380_v58 = vpop.eup %3379 }
 0x9ec   :  { %v891_v59 = vadd.f32 1.0, %v3380_v58 }
 0x9ee   :  { %3381 = vrcp.f32 %v891_v59 }
 0x9f8   :  { %v3382_v60 = vpop.eup %3381 }
 0x9f9   :  { %v894_v61 = vmul.f32 2.0, %v3382_v60  ;;  %v896_v10 = vmul.f32 %v3382_v60, %v765_v49 }
 0x9fb   :  { %v2792_v63 = vadd.f32 -1.0, %v894_v61 }
 0x9fd   :  { %898 = vrot.lane.b32.xlu0 %v2792_v63, %s3554_s3 }
 0xa6f   :  { %v899_v0 = vpop.permute.xlu0 %898 }
 0xa70   :  { %v901_v1 = vmul.f32 %v3382_v60, %v899_v0 }
 0xa72   :  { %903 = vrot.lane.b32.xlu1 %v901_v1, %s3555_s29 }
 0xa76   :  { %82 = vbcast.lane.b32.xlu1 %v80_v9, 256 }
 0xae4   :  { %v904_v11 = vpop.permute.xlu1 %903 }
 0xae5   :  { %v906_v12 = vadd.f32 %v904_v11, %v896_v10  ;;  %v100_v10 = vsub.s32 7, %v3620_v3 }
 0xae7   :  { %3383 = vtanh.f32 %v906_v12 }
 0xae8   :  { %v83_v13 = vpop.permute.xlu1 %82 }
 0xae9   :  { %vm165_vm6 = vcmp.eq.s32.totalorder %v3666_v40, %v83_v13 }
 0xaea   :  { %2999 = vmatprep.mubr.msk.f32.mxu0 %vm165_vm6, %v3553_v42 }
 0xaf1   :  { %v3384_v15 = vpop.eup %3383 }
 0xaf2   :  { %909 = vrot.lane.b32.xlu0 %v3384_v15, %s3554_s3 }
 0xaf6   :  { %89 = vbcast.lane.b32.xlu0 %v87_v16, 256 }
 0xb64   :  { %v910_v18 = vpop.permute.xlu0 %909 }
 0xb65   :  { %v3743_v19 = vmul.f32 %v3382_v60, %v910_v18  ;;  %v93_v60 = vsub.s32 6, %v3620_v3 }
 0xb67   :  { %954 = vrot.lane.b32.xlu1 %v3743_v19, %s3555_s29  ;;  %v94_v61 = vrot.slane %v3629_v7, %v93_v60 }
 0xb68   :  { %v90_v20 = vpop.permute.xlu0 %89 }
 0xb69   :  { %vm166_vm7 = vcmp.eq.s32.totalorder %v3666_v40, %v90_v20 }
 0xb6a   :  { %3000 = vmatmul.mubr.msk.f32.gmra.mrb[4].mxu0 %vm166_vm7, %v3553_v42 }
 0xbd9   :  { %v955_v21 = vpop.permute.xlu1 %954 }
 0xbda   :  { %3070 = vmatmul.mubr.msk.f32.vlgmr.msra.gmra.mrb[8].mxu1 %vm377_vm3, %v955_v21 }
 0xbdb   :  { %3268 = vmatpush3.bf16.msra.mxu1 %v3643_v23  ;;  %3080 = vmatprep.mubr.msk.f32.mxu1 %vm3551_vm0, %v3552_v4 }
 0xbdc   :  { %3269 = vmatprep.subr.bf16.mxu1 %v3550_v2 }
 0xbdf   :  { %3271 = vmatpush3.bf16.msra.mxu1 %v3652_v26 }
 0xbe0   :  { %3272 = vmatprep.subr.bf16.mxu1 %v3550_v2 }
 0xc3d   :  { %v3001_v22 = vpop.f32.mrb[4].mxu0 }
 0xc3e   :  { %v311_v25 = vpop.f32.mrb[5].mxu0 }
 0xcad   :  { %v1024_v27 = vpop.f32.mrb[8].mxu1 }
 0xcae   :  { %v1028_v28 = vadd.f32 %v1024_v27, %v311_v25  ;;  %v3071_v30 = vpop.f32.mrb[9].mxu1 }
 0xcb0   :  { %v2795_v31 = vmul.f32 -1.442695, %v1028_v28 }
 0xcb2   :  { %3385 = vpow2.f32 %v2795_v31 }
 0xcbc   :  { %v3386_v32 = vpop.eup %3385 }
 0xcbd   :  { %v1032_v33 = vadd.f32 1.0, %v3386_v32 }
 0xcbf   :  { %3387 = vrcp.f32 %v1032_v33 }
 0xcc9   :  { %v3388_v34 = vpop.eup %3387 }
 0xcca   :  { %v1035_v35 = vmul.f32 2.0, %v3388_v34  ;;  %v1037_v39 = vmul.f32 %v3388_v34, %v906_v12  ;;  %v101_v12 = vrot.slane %v3629_v7, %v100_v10 }
 0xccc   :  { %v2796_v36 = vadd.f32 -1.0, %v1035_v35 }
 0xcce   :  { %1039 = vrot.lane.b32.xlu0 %v2796_v36, %s3554_s3  ;;  %v46_v36 = vld [vmem:[%s4232_s0 + $0x8] sm:$0xff] }
 0xd40   :  { %v1040_v37 = vpop.permute.xlu0 %1039 }
 0xd41   :  { %v1042_v38 = vmul.f32 %v3388_v34, %v1040_v37  ;;  %v108_v37 = vrot.slane %v46_v36, %v51_v5 }
 0xd43   :  { %1044 = vrot.lane.b32.xlu1 %v1042_v38, %s3555_s29  ;;  %v122_v38 = vrot.slane %v46_v36, %v65_v17  ;;  %v115_v17 = vrot.slane %v46_v36, %v58_v6 }
 0xdb5   :  { %v1045_v41 = vpop.permute.xlu1 %1044 }
 0xdb6   :  { %v1047_v43 = vadd.f32 %v1045_v41, %v1037_v39  ;;  %v136_v39 = vrot.slane %v46_v36, %v79_v8  ;;  %v150_v41 = vrot.slane %v46_v36, %v93_v60  ;;  %v129_v8 = vrot.slane %v46_v36, %v72_v24 }
 0xdb8   :  { %3389 = vtanh.f32 %v1047_v43 }
 0xdc2   :  { %v3390_v44 = vpop.eup %3389 }
 0xdc3   :  { %1050 = vrot.lane.b32.xlu0 %v3390_v44, %s3554_s3 }
 0xe35   :  { %v1051_v45 = vpop.permute.xlu0 %1050 }
 0xe36   :  { %v3759_v46 = vmul.f32 %v3388_v34, %v1051_v45 }
 0xe38   :  { %1095 = vrot.lane.b32.xlu1 %v3759_v46, %s3555_s29 }
 0xeaa   :  { %v1096_v47 = vpop.permute.xlu1 %1095 }
 0xeab   :  { %3081 = vmatmul.mubr.msk.f32.vlgmr.msra.gmra.mrb[10].mxu1 %vm377_vm3, %v1096_v47 }
 0xeac   :  { %3274 = vmatpush3.bf16.msra.mxu1 %v3643_v23  ;;  %3091 = vmatprep.mubr.msk.f32.mxu1 %vm3551_vm0, %v3552_v4 }
 0xead   :  { %3275 = vmatprep.subr.bf16.mxu1 %v3550_v2 }
 0xeb0   :  { %3277 = vmatpush3.bf16.msra.mxu1 %v3652_v26 }
 0xeb1   :  { %3284 = vmatprep.subr.bf16.mxu1 %v3550_v2 }
 0xf7e   :  { %v1165_v48 = vpop.f32.mrb[10].mxu1 }
 0xf7f   :  { %v1169_v49 = vadd.f32 %v3001_v22, %v1165_v48  ;;  %v3082_v50 = vpop.f32.mrb[11].mxu1  ;;  %v143_v48 = vrot.slane %v46_v36, %v86_v14 }
 0xf81   :  { %v2799_v51 = vmul.f32 -1.442695, %v1169_v49  ;;  %v157_v49 = vrot.slane %v46_v36, %v100_v10 }
 0xf83   :  { %3391 = vpow2.f32 %v2799_v51 }
 0xf8d   :  { %v3392_v53 = vpop.eup %3391 }
 0xf8e   :  { %v1173_v54 = vadd.f32 1.0, %v3392_v53 }
 0xf90   :  { %3393 = vrcp.f32 %v1173_v54 }
 0xf9a   :  { %v3394_v55 = vpop.eup %3393 }
 0xf9b   :  { %v1176_v56 = vmul.f32 2.0, %v3394_v55  ;;  %v1178_v63 = vmul.f32 %v3394_v55, %v1047_v43 }
 0xf9d   :  { %v2800_v57 = vadd.f32 -1.0, %v1176_v56 }
 0xf9f   :  { %1180 = vrot.lane.b32.xlu0 %v2800_v57, %s3554_s3 }
0x1011   :  { %v1181_v58 = vpop.permute.xlu0 %1180 }
0x1012   :  { %v1183_v59 = vmul.f32 %v3394_v55, %v1181_v58 }
0x1014   :  { %1185 = vrot.lane.b32.xlu1 %v1183_v59, %s3555_s29 }
0x1018   :  { %96 = vbcast.lane.b32.xlu1 %v94_v61, 256 }
0x1086   :  { %v1186_v0 = vpop.permute.xlu1 %1185 }
0x1087   :  { %v1188_v1 = vadd.f32 %v1186_v0, %v1178_v63 }
0x1089   :  { %3395 = vtanh.f32 %v1188_v1 }
0x108a   :  { %v97_v9 = vpop.permute.xlu1 %96 }
0x108b   :  { %vm167_vm8 = vcmp.eq.s32.totalorder %v3666_v40, %v97_v9 }
0x108c   :  { %3002 = vmatprep.mubr.msk.f32.mxu0 %vm167_vm8, %v3553_v42 }
0x1093   :  { %v3396_v11 = vpop.eup %3395 }
0x1094   :  { %1191 = vrot.lane.b32.xlu0 %v3396_v11, %s3554_s3 }
0x1098   :  { %103 = vbcast.lane.b32.xlu0 %v101_v12, 256 }
0x1106   :  { %v1192_v13 = vpop.permute.xlu0 %1191 }
0x1107   :  { %v3779_v15 = vmul.f32 %v3394_v55, %v1192_v13 }
0x1109   :  { %1236 = vrot.lane.b32.xlu1 %v3779_v15, %s3555_s29 }
0x110a   :  { %v104_v16 = vpop.permute.xlu0 %103 }
0x110b   :  { %vm168_vm9 = vcmp.eq.s32.totalorder %v3666_v40, %v104_v16 }
0x110c   :  { %3003 = vmatmul.mubr.msk.f32.gmra.mrb[6].mxu0 %vm168_vm9, %v3553_v42 }
0x117b   :  { %v1237_v18 = vpop.permute.xlu1 %1236 }
0x117c   :  { %3092 = vmatmul.mubr.msk.f32.vlgmr.msra.gmra.mrb[12].mxu1 %vm377_vm3, %v1237_v18 }
0x117d   :  { %3286 = vmatpush3.bf16.msra.mxu1 %v3643_v23  ;;  %3113 = vmatprep.mubr.msk.f32.mxu1 %vm3551_vm0, %v3552_v4 }
0x117e   :  { %3287 = vmatprep.subr.bf16.mxu1 %v3550_v2 }
0x1181   :  { %3289 = vmatpush3.bf16.msra.mxu1 %v3652_v26 }
0x1182   :  { %3296 = vmatprep.subr.bf16.mxu1 %v3550_v2 }
0x11df   :  { %v3792_v7 = vpop.f32.mrb[6].mxu0 }
0x11e0   :  { %v321_v20 = vpop.f32.mrb[7].mxu0 }
0x124f   :  { %v1306_v21 = vpop.f32.mrb[12].mxu1 }
0x1250   :  { %v1310_v22 = vadd.f32 %v1306_v21, %v321_v20  ;;  %v3093_v25 = vpop.f32.mrb[13].mxu1 }
0x1252   :  { %v2803_v27 = vmul.f32 -1.442695, %v1310_v22 }
0x1254   :  { %3397 = vpow2.f32 %v2803_v27 }
0x125e   :  { %v3398_v28 = vpop.eup %3397 }
0x125f   :  { %v1314_v30 = vadd.f32 1.0, %v3398_v28 }
0x1261   :  { %3399 = vrcp.f32 %v1314_v30 }
0x126b   :  { %v3400_v31 = vpop.eup %3399 }
0x126c   :  { %v1317_v32 = vmul.f32 2.0, %v3400_v31  ;;  %v1319_v43 = vmul.f32 %v3400_v31, %v1188_v1 }
0x126e   :  { %v2804_v33 = vadd.f32 -1.0, %v1317_v32 }
0x1270   :  { %1321 = vrot.lane.b32.xlu0 %v2804_v33, %s3554_s3 }
0x12e2   :  { %v1322_v34 = vpop.permute.xlu0 %1321 }
0x12e3   :  { %v1324_v35 = vmul.f32 %v3400_v31, %v1322_v34 }
0x12e5   :  { %1326 = vrot.lane.b32.xlu1 %v1324_v35, %s3555_s29 }
0x12e9   :  { %110 = vbcast.lane.b32.xlu1 %v108_v37, 256 }
0x12ed   :  { %124 = vbcast.lane.b32.xlu1 %v122_v38, 256 }
0x12f1   :  { %138 = vbcast.lane.b32.xlu1 %v136_v39, 256 }
0x12f5   :  { %152 = vbcast.lane.b32.xlu1 %v150_v41, 256 }
0x1357   :  { %v1327_v44 = vpop.permute.xlu1 %1326 }
0x1358   :  { %v3805_v45 = vadd.f32 %v1327_v44, %v1319_v43 }
0x135a   :  { %3401 = vtanh.f32 %v3805_v45 }
0x135b   :  { %v111_v47 = vpop.permute.xlu1 %110 }
0x135c   :  { %vm169_vm10 = vcmp.eq.s32.totalorder %v3666_v40, %v111_v47 }
0x135d   :  { %3005 = vmatprep.mubr.msk.f32.mxu0 %vm169_vm10, %v3553_v42 }
0x135f   :  { %v125_v50 = vpop.permute.xlu1 %124 }
0x1360   :  { %vm171_vm11 = vcmp.eq.s32.totalorder %v3666_v40, %v125_v50 }
0x1363   :  { %v139_v54 = vpop.permute.xlu1 %138 }
0x1364   :  { %v3402_v5 = vpop.eup %3401  ;;  %vm173_vm13 = vcmp.eq.s32.totalorder %v3666_v40, %v139_v54 }
0x1365   :  { %1332 = vrot.lane.b32.xlu0 %v3402_v5, %s3554_s3 }
0x1367   :  { %v153_v24 = vpop.permute.xlu1 %152 }
0x1368   :  { %vm175_vm15 = vcmp.eq.s32.totalorder %v3666_v40, %v153_v24 }
0x1369   :  { %117 = vbcast.lane.b32.xlu0 %v115_v17, 256 }
0x136d   :  { %131 = vbcast.lane.b32.xlu0 %v129_v8, 256 }
0x1371   :  { %145 = vbcast.lane.b32.xlu0 %v143_v48, 256 }
0x1375   :  { %159 = vbcast.lane.b32.xlu0 %v157_v49, 256 }
0x13d7   :  { %v1333_v51 = vpop.permute.xlu0 %1332 }
0x13d8   :  { %v3817_v53 = vmul.f32 %v3400_v31, %v1333_v51 }
0x13da   :  { %1377 = vrot.lane.b32.xlu1 %v3817_v53, %s3555_s29 }
0x13db   :  { %v118_v6 = vpop.permute.xlu0 %117 }
0x13dc   :  { %vm170_vm12 = vcmp.eq.s32.totalorder %v3666_v40, %v118_v6 }
0x13dd   :  { %3006 = vmatmul.mubr.msk.f32.gmra.mrb[8].mxu0 %vm170_vm12, %v3553_v42 }
0x13de   :  { %3008 = vmatprep.mubr.msk.f32.mxu0 %vm171_vm11, %v3553_v42 }
0x13df   :  { %v132_v3 = vpop.permute.xlu0 %131 }
0x13e0   :  { %vm172_vm14 = vcmp.eq.s32.totalorder %v3666_v40, %v132_v3 }
0x13e1   :  { %3009 = vmatmul.mubr.msk.f32.gmra.mrb[10].mxu0 %vm172_vm14, %v3553_v42 }
0x13e2   :  { %3011 = vmatprep.mubr.msk.f32.mxu0 %vm173_vm13, %v3553_v42 }
0x13e3   :  { %v146_v14 = vpop.permute.xlu0 %145 }
0x13e4   :  { %vm174_vm1 = vcmp.eq.s32.totalorder %v3666_v40, %v146_v14 }
0x13e5   :  { %3012 = vmatmul.mubr.msk.f32.gmra.mrb[12].mxu0 %vm174_vm1, %v3553_v42 }
0x13e6   :  { %3014 = vmatprep.mubr.msk.f32.mxu0 %vm175_vm15, %v3553_v42 }
0x13e7   :  { %v160_v55 = vpop.permute.xlu0 %159 }
0x13e8   :  { %vm176_vm2 = vcmp.eq.s32.totalorder %v3666_v40, %v160_v55 }
0x13e9   :  { %3015 = vmatmul.mubr.msk.f32.gmra.mrb[14].mxu0 %vm176_vm2, %v3553_v42 }
0x13ea   :  { %3102 = vmatprep.mubr.msk.f32.mxu0 %vm3551_vm0, %v3552_v4 }
0x144c   :  { %v1378_v56 = vpop.permute.xlu1 %1377 }
0x144d   :  { %3103 = vmatmul.mubr.msk.f32.vlgmr.msra.gmra.mrb[16].mxu0 %vm377_vm3, %v1378_v56 }
0x144e   :  { %3292 = vmatpush3.bf16.msra.mxu0 %v3643_v23  ;;  %3124 = vmatprep.mubr.msk.f32.mxu0 %vm3551_vm0, %v3552_v4 }
0x144f   :  { %3293 = vmatprep.subr.bf16.mxu0 %v3550_v2 }
0x1452   :  { %3295 = vmatpush3.bf16.msra.mxu0 %v3652_v26 }
0x1453   :  { %3302 = vmatprep.subr.bf16.mxu0 %v3550_v2 }
0x14b0   :  { %v3844_v40 = vpop.f32.mrb[8].mxu0 }
0x14b1   :  { %v331_v42 = vpop.f32.mrb[9].mxu0 }
0x14b4   :  { %v3846_v57 = vpop.f32.mrb[10].mxu0 }
0x14b5   :  { %v3848_v58 = vpop.f32.mrb[11].mxu0 }
0x14b8   :  { %v3850_v59 = vpop.f32.mrb[12].mxu0 }
0x14b9   :  { %v3852_v60 = vpop.f32.mrb[13].mxu0 }
0x14bc   :  { %v3854_v61 = vpop.f32.mrb[14].mxu0 }
0x14bd   :  { %v3856_v63 = vpop.f32.mrb[15].mxu0 }
0x1520   :  { %v1447_v0 = vpop.f32.mrb[16].mxu0 }
0x1521   :  { %v1451_v1 = vadd.f32 %v3792_v7, %v1447_v0  ;;  %v3104_v9 = vpop.f32.mrb[17].mxu0 }
0x1523   :  { %v2807_v10 = vmul.f32 -1.442695, %v1451_v1 }
0x1525   :  { %3403 = vpow2.f32 %v2807_v10 }
0x152f   :  { %v3404_v11 = vpop.eup %3403 }
0x1530   :  { %v1455_v12 = vadd.f32 1.0, %v3404_v11 }
0x1532   :  { %3405 = vrcp.f32 %v1455_v12 }
0x153c   :  { %v3406_v13 = vpop.eup %3405 }
0x153d   :  { %v1458_v16 = vmul.f32 2.0, %v3406_v13  ;;  %v1460_v22 = vmul.f32 %v3406_v13, %v3805_v45 }
0x153f   :  { %v2808_v18 = vadd.f32 -1.0, %v1458_v16 }
0x1541   :  { %1462 = vrot.lane.b32.xlu0 %v2808_v18, %s3554_s3 }
0x15b3   :  { %v1463_v20 = vpop.permute.xlu0 %1462 }
0x15b4   :  { %v1465_v21 = vmul.f32 %v3406_v13, %v1463_v20 }
0x15b6   :  { %1467 = vrot.lane.b32.xlu1 %v1465_v21, %s3555_s29 }
0x1628   :  { %v1468_v25 = vpop.permute.xlu1 %1467 }
0x1629   :  { %v1470_v27 = vadd.f32 %v1468_v25, %v1460_v22 }
0x162b   :  { %3407 = vtanh.f32 %v1470_v27 }
0x1635   :  { %v3408_v7 = vpop.eup %3407 }
0x1636   :  { %1473 = vrot.lane.b32.xlu0 %v3408_v7, %s3554_s3 }
0x16a8   :  { %v1474_v28 = vpop.permute.xlu0 %1473 }
0x16a9   :  { %v3863_v30 = vmul.f32 %v3406_v13, %v1474_v28 }
0x16ab   :  { %1518 = vrot.lane.b32.xlu1 %v3863_v30, %s3555_s29 }
0x171d   :  { %v1519_v31 = vpop.permute.xlu1 %1518 }
0x171e   :  { %3114 = vmatmul.mubr.msk.f32.vlgmr.msra.gmra.mrb[14].mxu1 %vm377_vm3, %v1519_v31 }
0x171f   :  { %3298 = vmatpush3.bf16.msra.mxu1 %v3643_v23  ;;  %3135 = vmatprep.mubr.msk.f32.mxu1 %vm3551_vm0, %v3552_v4 }
0x1720   :  { %3299 = vmatprep.subr.bf16.mxu1 %v3550_v2 }
0x1723   :  { %3301 = vmatpush3.bf16.msra.mxu1 %v3652_v26 }
0x1724   :  { %3308 = vmatprep.subr.bf16.mxu1 %v3550_v2 }
0x17f1   :  { %v1588_v32 = vpop.f32.mrb[14].mxu1 }
0x17f2   :  { %v1592_v33 = vadd.f32 %v1588_v32, %v331_v42  ;;  %v3115_v34 = vpop.f32.mrb[15].mxu1 }
0x17f4   :  { %v2811_v35 = vmul.f32 -1.442695, %v1592_v33 }
0x17f6   :  { %3409 = vpow2.f32 %v2811_v35 }
0x1800   :  { %v3410_v36 = vpop.eup %3409 }
0x1801   :  { %v1596_v37 = vadd.f32 1.0, %v3410_v36 }
0x1803   :  { %3411 = vrcp.f32 %v1596_v37 }
0x180d   :  { %v3412_v38 = vpop.eup %3411 }
0x180e   :  { %v1599_v39 = vmul.f32 2.0, %v3412_v38  ;;  %v1601_v45 = vmul.f32 %v3412_v38, %v1470_v27 }
0x1810   :  { %v2812_v41 = vadd.f32 -1.0, %v1599_v39 }
0x1812   :  { %1603 = vrot.lane.b32.xlu0 %v2812_v41, %s3554_s3 }
0x1884   :  { %v1604_v43 = vpop.permute.xlu0 %1603 }
0x1885   :  { %v1606_v44 = vmul.f32 %v3412_v38, %v1604_v43 }
0x1887   :  { %1608 = vrot.lane.b32.xlu1 %v1606_v44, %s3555_s29 }
0x18f9   :  { %v1609_v47 = vpop.permute.xlu1 %1608 }
0x18fa   :  { %v1611_v5 = vadd.f32 %v1609_v47, %v1601_v45 }
0x18fc   :  { %3413 = vtanh.f32 %v1611_v5 }
0x1906   :  { %v3414_v17 = vpop.eup %3413 }
0x1907   :  { %1614 = vrot.lane.b32.xlu0 %v3414_v17, %s3554_s3 }
0x1979   :  { %v1615_v8 = vpop.permute.xlu0 %1614 }
0x197a   :  { %v3877_v48 = vmul.f32 %v3412_v38, %v1615_v8 }
0x197c   :  { %1659 = vrot.lane.b32.xlu1 %v3877_v48, %s3555_s29 }
0x19ee   :  { %v1660_v49 = vpop.permute.xlu1 %1659 }
0x19ef   :  { %3125 = vmatmul.mubr.msk.f32.vlgmr.msra.gmra.mrb[18].mxu0 %vm377_vm3, %v1660_v49 }
0x19f0   :  { %3304 = vmatpush3.bf16.msra.mxu0 %v3643_v23  ;;  %3146 = vmatprep.mubr.msk.f32.mxu0 %vm3551_vm0, %v3552_v4 }
0x19f1   :  { %3305 = vmatprep.subr.bf16.mxu0 %v3550_v2 }
0x19f4   :  { %3307 = vmatpush3.bf16.msra.mxu0 %v3652_v26 }
0x19f5   :  { %3314 = vmatprep.subr.bf16.mxu0 %v3550_v2 }
0x1ac2   :  { %v1729_v50 = vpop.f32.mrb[18].mxu0 }
0x1ac3   :  { %v1733_v51 = vadd.f32 %v3844_v40, %v1729_v50  ;;  %v3126_v54 = vpop.f32.mrb[19].mxu0 }
0x1ac5   :  { %v2815_v6 = vmul.f32 -1.442695, %v1733_v51 }
0x1ac7   :  { %3415 = vpow2.f32 %v2815_v6 }
0x1ad1   :  { %v3416_v3 = vpop.eup %3415 }
0x1ad2   :  { %v1737_v24 = vadd.f32 1.0, %v3416_v3 }
0x1ad4   :  { %3417 = vrcp.f32 %v1737_v24 }
0x1ade   :  { %v3418_v14 = vpop.eup %3417 }
0x1adf   :  { %v1740_v55 = vmul.f32 2.0, %v3418_v14  ;;  %v1742_v1 = vmul.f32 %v3418_v14, %v1611_v5 }
0x1ae1   :  { %v2816_v56 = vadd.f32 -1.0, %v1740_v55 }
0x1ae3   :  { %1744 = vrot.lane.b32.xlu0 %v2816_v56, %s3554_s3 }
0x1b55   :  { %v1745_v42 = vpop.permute.xlu0 %1744 }
0x1b56   :  { %v1747_v0 = vmul.f32 %v3418_v14, %v1745_v42 }
0x1b58   :  { %1749 = vrot.lane.b32.xlu1 %v1747_v0, %s3555_s29 }
0x1bca   :  { %v1750_v9 = vpop.permute.xlu1 %1749 }
0x1bcb   :  { %v1752_v10 = vadd.f32 %v1750_v9, %v1742_v1 }
0x1bcd   :  { %3419 = vtanh.f32 %v1752_v10 }
0x1bd7   :  { %v3420_v40 = vpop.eup %3419 }
0x1bd8   :  { %1755 = vrot.lane.b32.xlu0 %v3420_v40, %s3554_s3 }
0x1c4a   :  { %v1756_v11 = vpop.permute.xlu0 %1755 }
0x1c4b   :  { %v3892_v12 = vmul.f32 %v3418_v14, %v1756_v11 }
0x1c4d   :  { %1800 = vrot.lane.b32.xlu1 %v3892_v12, %s3555_s29 }
0x1cbf   :  { %v1801_v13 = vpop.permute.xlu1 %1800 }
0x1cc0   :  { %3136 = vmatmul.mubr.msk.f32.vlgmr.msra.gmra.mrb[16].mxu1 %vm377_vm3, %v1801_v13 }
0x1cc1   :  { %3310 = vmatpush3.bf16.msra.mxu1 %v3643_v23  ;;  %3157 = vmatprep.mubr.msk.f32.mxu1 %vm3551_vm0, %v3552_v4 }
0x1cc2   :  { %3311 = vmatprep.subr.bf16.mxu1 %v3550_v2 }
0x1cc5   :  { %3313 = vmatpush3.bf16.msra.mxu1 %v3652_v26 }
0x1cc6   :  { %3320 = vmatprep.subr.bf16.mxu1 %v3550_v2 }
0x1d93   :  { %v1870_v16 = vpop.f32.mrb[16].mxu1 }
0x1d94   :  { %v1874_v18 = vadd.f32 %v1870_v16, %v3848_v58  ;;  %v3137_v20 = vpop.f32.mrb[17].mxu1 }
0x1d96   :  { %v2819_v21 = vmul.f32 -1.442695, %v1874_v18 }
0x1d98   :  { %3421 = vpow2.f32 %v2819_v21 }
0x1da2   :  { %v3422_v22 = vpop.eup %3421 }
0x1da3   :  { %v1878_v25 = vadd.f32 1.0, %v3422_v22 }
0x1da5   :  { %3423 = vrcp.f32 %v1878_v25 }
0x1daf   :  { %v3424_v27 = vpop.eup %3423 }
0x1db0   :  { %v1881_v7 = vmul.f32 2.0, %v3424_v27  ;;  %v1883_v33 = vmul.f32 %v3424_v27, %v1752_v10 }
0x1db2   :  { %v2820_v28 = vadd.f32 -1.0, %v1881_v7 }
0x1db4   :  { %1885 = vrot.lane.b32.xlu0 %v2820_v28, %s3554_s3 }
0x1e26   :  { %v1886_v31 = vpop.permute.xlu0 %1885 }
0x1e27   :  { %v1888_v32 = vmul.f32 %v3424_v27, %v1886_v31 }
0x1e29   :  { %1890 = vrot.lane.b32.xlu1 %v1888_v32, %s3555_s29 }
0x1e9b   :  { %v1891_v34 = vpop.permute.xlu1 %1890 }
0x1e9c   :  { %v1893_v35 = vadd.f32 %v1891_v34, %v1883_v33 }
0x1e9e   :  { %3425 = vtanh.f32 %v1893_v35 }
0x1ea8   :  { %v3426_v58 = vpop.eup %3425 }
0x1ea9   :  { %1896 = vrot.lane.b32.xlu0 %v3426_v58, %s3554_s3 }
0x1f1b   :  { %v1897_v36 = vpop.permute.xlu0 %1896 }
0x1f1c   :  { %v3907_v37 = vmul.f32 %v3424_v27, %v1897_v36 }
0x1f1e   :  { %1941 = vrot.lane.b32.xlu1 %v3907_v37, %s3555_s29 }
0x1f90   :  { %v1942_v38 = vpop.permute.xlu1 %1941 }
0x1f91   :  { %3147 = vmatmul.mubr.msk.f32.vlgmr.msra.gmra.mrb[20].mxu0 %vm377_vm3, %v1942_v38 }
0x1f92   :  { %3316 = vmatpush3.bf16.msra.mxu0 %v3643_v23  ;;  %3168 = vmatprep.mubr.msk.f32.mxu0 %vm3551_vm0, %v3552_v4 }
0x1f93   :  { %3317 = vmatprep.subr.bf16.mxu0 %v3550_v2 }
0x1f96   :  { %3319 = vmatpush3.bf16.msra.mxu0 %v3652_v26 }
0x1f97   :  { %3326 = vmatprep.subr.bf16.mxu0 %v3550_v2 }
0x2064   :  { %v2011_v39 = vpop.f32.mrb[20].mxu0 }
0x2065   :  { %v2015_v41 = vadd.f32 %v3846_v57, %v2011_v39  ;;  %v3148_v43 = vpop.f32.mrb[21].mxu0 }
0x2067   :  { %v2823_v44 = vmul.f32 -1.442695, %v2015_v41 }
0x2069   :  { %3427 = vpow2.f32 %v2823_v44 }
0x2073   :  { %v3428_v45 = vpop.eup %3427 }
0x2074   :  { %v2019_v47 = vadd.f32 1.0, %v3428_v45 }
0x2076   :  { %3429 = vrcp.f32 %v2019_v47 }
0x2080   :  { %v3430_v5 = vpop.eup %3429 }
0x2081   :  { %v2022_v17 = vmul.f32 2.0, %v3430_v5  ;;  %v2024_v51 = vmul.f32 %v3430_v5, %v1893_v35 }
0x2083   :  { %v2824_v8 = vadd.f32 -1.0, %v2022_v17 }
0x2085   :  { %2026 = vrot.lane.b32.xlu0 %v2824_v8, %s3554_s3 }
0x20f7   :  { %v2027_v49 = vpop.permute.xlu0 %2026 }
0x20f8   :  { %v2029_v50 = vmul.f32 %v3430_v5, %v2027_v49 }
0x20fa   :  { %2031 = vrot.lane.b32.xlu1 %v2029_v50, %s3555_s29 }
0x216c   :  { %v2032_v54 = vpop.permute.xlu1 %2031 }
0x216d   :  { %v2034_v6 = vadd.f32 %v2032_v54, %v2024_v51 }
0x216f   :  { %3431 = vtanh.f32 %v2034_v6 }
0x2179   :  { %v3432_v57 = vpop.eup %3431 }
0x217a   :  { %2037 = vrot.lane.b32.xlu0 %v3432_v57, %s3554_s3 }
0x21ec   :  { %v2038_v3 = vpop.permute.xlu0 %2037 }
0x21ed   :  { %v3922_v24 = vmul.f32 %v3430_v5, %v2038_v3 }
0x21ef   :  { %2082 = vrot.lane.b32.xlu1 %v3922_v24, %s3555_s29 }
0x2261   :  { %v2083_v14 = vpop.permute.xlu1 %2082 }
0x2262   :  { %3158 = vmatmul.mubr.msk.f32.vlgmr.msra.gmra.mrb[18].mxu1 %vm377_vm3, %v2083_v14  ;;  %v3556_v14 = vmov 0  }
0x2263   :  { %3322 = vmatpush3.bf16.msra.mxu1 %v3643_v23  ;;  %3179 = vmatprep.mubr.msk.f32.mxu1 %vm3551_vm0, %v3552_v4 }
0x2264   :  { %3323 = vmatprep.subr.bf16.mxu1 %v3550_v2  ;;  %3349 = vset.pattern.permute.xlu0 %v3556_v14 }
0x2265   :  { %3360 = vset.pattern.permute.xlu1 %v3556_v14 }
0x2267   :  { %3325 = vmatpush3.bf16.msra.mxu1 %v3652_v26 }
0x2268   :  { %3332 = vmatprep.subr.bf16.mxu1 %v3550_v2 }
0x2335   :  { %v2152_v55 = vpop.f32.mrb[18].mxu1 }
0x2336   :  { %v2156_v56 = vadd.f32 %v2152_v55, %v3852_v60  ;;  %v3159_v42 = vpop.f32.mrb[19].mxu1 }
0x2337   :  { %v3967_v42 = vld [vmem:[%s4233_s1] sm:$0xff] }
0x2338   :  { %v2827_v0 = vmul.f32 -1.442695, %v2156_v56  ;;  %vm631_vm4 = vcmp.gt.s32.totalorder %v3967_v42, 1  ;;  %vm772_vm5 = vcmp.gt.s32.totalorder %v3967_v42, 2  ;;  %vm913_vm6 = vcmp.gt.s32.totalorder %v3967_v42, 3 }
0x2339   :  { %vm1054_vm7 = vcmp.gt.s32.totalorder %v3967_v42, 4  ;;  %vm1336_vm8 = vcmp.gt.s32.totalorder %v3967_v42, 6  ;;  %vm1477_vm9 = vcmp.gt.s32.totalorder %v3967_v42, 7  ;;  %vm1618_vm10 = vcmp.gt.s32.totalorder %v3967_v42, 8 }
0x233a   :  { %3433 = vpow2.f32 %v2827_v0  ;;  %vm1759_vm11 = vcmp.gt.s32.totalorder %v3967_v42, 9  ;;  %vm1900_vm12 = vcmp.gt.s32.totalorder %v3967_v42, 10  ;;  %vm2182_vm13 = vcmp.gt.s32.totalorder %v3967_v42, 12 }
0x233b   :  { %vm2464_vm14 = vcmp.gt.s32.totalorder %v3967_v42, 14  ;;  %vm1195_vm15 = vcmp.gt.s32.totalorder %v3967_v42, 5  ;;  %vm2041_vm1 = vcmp.gt.s32.totalorder %v3967_v42, 11  ;;  %vm2323_vm2 = vcmp.gt.s32.totalorder %v3967_v42, 13 }
0x2344   :  { %v3434_v1 = vpop.eup %3433 }
0x2345   :  { %v2160_v9 = vadd.f32 1.0, %v3434_v1  ;;  %v2785_v1 = vsel %vm631_vm4, 1.0, %v3552_v4  ;;  %vm2738_vm4 = vcmask 31744  }
0x2347   :  { %3435 = vrcp.f32 %v2160_v9 }
0x2351   :  { %v3436_v10 = vpop.eup %3435 }
0x2352   :  { %v2163_v40 = vmul.f32 2.0, %v3436_v10  ;;  %v2165_v18 = vmul.f32 %v3436_v10, %v2034_v6 }
0x2354   :  { %v2828_v11 = vadd.f32 -1.0, %v2163_v40 }
0x2356   :  { %2167 = vrot.lane.b32.xlu0 %v2828_v11, %s3554_s3 }
0x23c8   :  { %v2168_v13 = vpop.permute.xlu0 %2167 }
0x23c9   :  { %v2170_v16 = vmul.f32 %v3436_v10, %v2168_v13  ;;  %v2780_v13 = vld [vmem:[%s4236_s4] ss:$0 sm:$0xff] }
0x23cb   :  { %2172 = vrot.lane.b32.xlu1 %v2170_v16, %s3555_s29 }
0x243d   :  { %v2173_v20 = vpop.permute.xlu1 %2172 }
0x243e   :  { %v2175_v21 = vadd.f32 %v2173_v20, %v2165_v18 }
0x2440   :  { %3437 = vtanh.f32 %v2175_v21 }
0x244a   :  { %v3438_v60 = vpop.eup %3437 }
0x244b   :  { %2178 = vrot.lane.b32.xlu0 %v3438_v60, %s3554_s3 }
0x24bd   :  { %v2179_v22 = vpop.permute.xlu0 %2178 }
0x24be   :  { %v3937_v25 = vmul.f32 %v3436_v10, %v2179_v22 }
0x24c0   :  { %2223 = vrot.lane.b32.xlu1 %v3937_v25, %s3555_s29 }
0x2532   :  { %v2224_v27 = vpop.permute.xlu1 %2223 }
0x2533   :  { %3169 = vmatmul.mubr.msk.f32.vlgmr.msra.gmra.mrb[22].mxu0 %vm377_vm3, %v2224_v27 }
0x2534   :  { %3328 = vmatpush3.bf16.msra.mxu0 %v3643_v23  ;;  %3190 = vmatprep.mubr.msk.f32.mxu0 %vm3551_vm0, %v3552_v4 }
0x2535   :  { %3329 = vmatprep.subr.bf16.mxu0 %v3550_v2 }
0x2538   :  { %3331 = vmatpush3.bf16.msra.mxu0 %v3652_v26 }
0x2606   :  { %v2293_v7 = vpop.f32.mrb[22].mxu0 }
0x2607   :  { %v2297_v28 = vadd.f32 %v3850_v59, %v2293_v7  ;;  %v3170_v31 = vpop.f32.mrb[23].mxu0 }
0x2609   :  { %v2831_v32 = vmul.f32 -1.442695, %v2297_v28 }
0x260b   :  { %3439 = vpow2.f32 %v2831_v32 }
0x2615   :  { %v3440_v33 = vpop.eup %3439 }
0x2616   :  { %v2301_v34 = vadd.f32 1.0, %v3440_v33 }
0x2618   :  { %3441 = vrcp.f32 %v2301_v34 }
0x2622   :  { %v3442_v35 = vpop.eup %3441 }
0x2623   :  { %v2304_v58 = vmul.f32 2.0, %v3442_v35  ;;  %v2306_v39 = vmul.f32 %v3442_v35, %v2175_v21 }
0x2625   :  { %v2832_v36 = vadd.f32 -1.0, %v2304_v58 }
0x2627   :  { %2308 = vrot.lane.b32.xlu0 %v2832_v36, %s3554_s3 }
0x2699   :  { %v2309_v23 = vpop.permute.xlu0 %2308 }
0x269a   :  { %v2311_v38 = vmul.f32 %v3442_v35, %v2309_v23 }
0x269c   :  { %2313 = vrot.lane.b32.xlu1 %v2311_v38, %s3555_s29 }
0x270e   :  { %v2314_v26 = vpop.permute.xlu1 %2313 }
0x270f   :  { %v2316_v41 = vadd.f32 %v2314_v26, %v2306_v39 }
0x2711   :  { %3443 = vtanh.f32 %v2316_v41 }
0x271b   :  { %v3444_v59 = vpop.eup %3443 }
0x271c   :  { %2319 = vrot.lane.b32.xlu0 %v3444_v59, %s3554_s3 }
0x278e   :  { %v2320_v43 = vpop.permute.xlu0 %2319 }
0x278f   :  { %v3951_v44 = vmul.f32 %v3442_v35, %v2320_v43 }
0x2791   :  { %2364 = vrot.lane.b32.xlu1 %v3951_v44, %s3555_s29 }
0x2803   :  { %v2365_v45 = vpop.permute.xlu1 %2364 }
0x2804   :  { %3180 = vmatmul.mubr.msk.f32.vlgmr.msra.gmra.mrb[20].mxu1 %vm377_vm3, %v2365_v45 }
0x2805   :  { %3201 = vmatprep.mubr.msk.f32.mxu1 %vm3551_vm0, %v3552_v4  ;;  %vm477_vm0 = vcmp.gt.s32.totalorder %v3967_v42, 0 }
0x2806   :  { %v2779_v0 = vsel %vm477_vm0, 1.0, %v3552_v4  ;;  %vm2605_vm0 = vcmp.gt.s32.totalorder %v3967_v42, 15 }
0x2807   :  { %v3350_v10 = vpack.i.bf16 %v2785_v1, %v2779_v0 }
0x28d7   :  { %v2434_v47 = vpop.f32.mrb[20].mxu1 }
0x28d8   :  { %v2438_v5 = vadd.f32 %v2434_v47, %v3856_v63  ;;  %v3181_v17 = vpop.f32.mrb[21].mxu1 }
0x28da   :  { %v2835_v8 = vmul.f32 -1.442695, %v2438_v5 }
0x28dc   :  { %3445 = vpow2.f32 %v2835_v8 }
0x28e6   :  { %v3446_v49 = vpop.eup %3445 }
0x28e7   :  { %v2442_v50 = vadd.f32 1.0, %v3446_v49 }
0x28e9   :  { %3447 = vrcp.f32 %v2442_v50 }
0x28f3   :  { %v3448_v51 = vpop.eup %3447 }
0x28f4   :  { %v2445_v54 = vmul.f32 2.0, %v3448_v51  ;;  %v2447_v55 = vmul.f32 %v3448_v51, %v2316_v41  ;;  %v4003_v41 = vld [vmem:[#allocation2] ss:$0 sm:$0xff] }
0x28f6   :  { %v2836_v6 = vadd.f32 -1.0, %v2445_v54 }
0x28f8   :  { %2449 = vrot.lane.b32.xlu0 %v2836_v6, %s3554_s3 }
0x296a   :  { %v2450_v57 = vpop.permute.xlu0 %2449 }
0x296b   :  { %v2452_v3 = vmul.f32 %v3448_v51, %v2450_v57 }
0x296d   :  { %2454 = vrot.lane.b32.xlu1 %v2452_v3, %s3555_s29 }
0x29df   :  { %v2455_v63 = vpop.permute.xlu1 %2454 }
0x29e0   :  { %v3961_v56 = vadd.f32 %v2455_v63, %v2447_v55 }
0x29e2   :  { %3449 = vtanh.f32 %v3961_v56 }
0x29ec   :  { %v3450_v9 = vpop.eup %3449 }
0x29ed   :  { %2460 = vrot.lane.b32.xlu0 %v3450_v9, %s3554_s3  ;;  %v2789_v9 = vsel %vm772_vm5, 1.0, %v3552_v4 }
0x29f1   :  { %3351 = vperm.xlu0 %3349, %v3350_v10   ;;  %v2793_v10 = vsel %vm913_vm6, 1.0, %v3552_v4 }
0x2a5f   :  { %v2461_v40 = vpop.permute.xlu0 %2460 }
0x2a60   :  { %v3974_v11 = vmul.f32 %v3448_v51, %v2461_v40 }
0x2a62   :  { %2505 = vrot.lane.b32.xlu1 %v3974_v11, %s3555_s29 }
0x2a66   :  { %491 = vrot.lane.b32.xlu1 %v2780_v13, %s3557_s12  ;;  %v3355_v13 = vpack.i.bf16 %v2793_v10, %v2789_v9 }
0x2a70   :  { %v3352_v16 = vpop.permute.xlu0 %3351 }
0x2a71   :  { %v3353_v18 = vunpack.i.l.bf16 %v3352_v16  ;;  %v3354_v21 = vunpack.i.h.bf16 %v3352_v16 }
0x2a73   :  { %v3983_v60 = vmul.f32 %v3353_v18, %v3679_v62  ;;  %v3990_v7 = vmul.f32 %v3354_v21, %v3703_v29 }
0x2ad4   :  { %v2506_v20 = vpop.permute.xlu1 %2505 }
0x2ad5   :  { %3191 = vmatmul.mubr.msk.f32.vlgmr.msra.gmra.mrb[24].mxu0 %vm377_vm3, %v2506_v20 }
0x2ad8   :  { %v3985_v22 = vpop.permute.xlu1 %491 }
0x2ad9   :  { %v494_v27 = vmul.f32 %v3985_v22, %v3983_v60  ;;  %v640_v28 = vmul.f32 %v3990_v7, %v3985_v22 }
0x2adb   :  { %496 = vrot.lane.b32.xlu1 %v494_v27, %s3555_s29 }
0x2adf   :  { %642 = vrot.lane.b32.xlu1 %v640_v28, %s3555_s29 }
0x2b4d   :  { %v497_v31 = vpop.permute.xlu1 %496 }
0x2b4e   :  { %v499_v32 = vsel %vm377_vm3, %v497_v31, 0.0 }
0x2b4f   :  { %500 = vadd.xlane.f32.xlu0 %v499_v32 }
0x2b51   :  { %v643_v62 = vpop.permute.xlu1 %642 }
0x2b52   :  { %v645_v33 = vsel %vm377_vm3, %v643_v62, 0.0 }
0x2b53   :  { %646 = vadd.xlane.f32.xlu1 %v645_v33 }
0x2ba8   :  { %v2575_v34 = vpop.f32.mrb[24].mxu0 }
0x2ba9   :  { %v2579_v35 = vadd.f32 %v3854_v61, %v2575_v34  ;;  %v3192_v29 = vpop.f32.mrb[25].mxu0 }
0x2bab   :  { %v2839_v58 = vmul.f32 -1.442695, %v2579_v35 }
0x2bad   :  { %3451 = vpow2.f32 %v2839_v58  ;;  %v2797_v58 = vsel %vm1054_vm7, 1.0, %v3552_v4 }
0x2bb7   :  { %v3452_v36 = vpop.eup %3451 }
0x2bb8   :  { %v2583_v23 = vadd.f32 1.0, %v3452_v36  ;;  %v2805_v36 = vsel %vm1336_vm8, 1.0, %v3552_v4 }
0x2bba   :  { %3453 = vrcp.f32 %v2583_v23  ;;  %v2809_v23 = vsel %vm1477_vm9, 1.0, %v3552_v4 }
0x2bc4   :  { %v3999_v38 = vpop.eup %3453 }
0x2bc5   :  { %v2586_v39 = vmul.f32 2.0, %v3999_v38 }
0x2bc7   :  { %v2840_v26 = vadd.f32 -1.0, %v2586_v39  ;;  %v2813_v39 = vsel %vm1618_vm10, 1.0, %v3552_v4 }
0x2bc9   :  { %2590 = vrot.lane.b32.xlu1 %v2840_v26, %s3554_s3  ;;  %v2817_v26 = vsel %vm1759_vm11, 1.0, %v3552_v4 }
0x2bdc   :  { %v501_v59 = vpop.xlane.xlu0 %500 }
0x2bdd   :  { %v508_v43 = vadd.f32 %v4003_v41, %v501_v59 }
0x2bdf   :  { %v509_v45 = vsub.f32 -inf, %v508_v43  ;;  %v512_v61 = vsub.f32 %v508_v43, %v508_v43 }
0x2be0   :  { %v647_v47 = vpop.xlane.xlu1 %646 }
0x2be1   :  { %v510_v5 = vmul.f32 1.442695, %v509_v45  ;;  %v648_v17 = vadd.f32 %v4003_v41, %v647_v47  ;;  %v513_v8 = vmul.f32 1.442695, %v512_v61  ;;  %v2821_v61 = vsel %vm1900_vm12, 1.0, %v3552_v4 }
0x2be2   :  { %v2829_v47 = vsel %vm2182_vm13, 1.0, %v3552_v4 }
0x2be3   :  { %3455 = vpow2.f32 %v510_v5  ;;  %v4007_v49 = vmax.f32 %v508_v43, %v648_v17  ;;  %v2837_v5 = vsel %vm2464_vm14, 1.0, %v3552_v4 }
0x2be4   :  { %3457 = vpow2.f32 %v513_v8 }
0x2be5   :  { %v650_v50 = vsub.f32 %v508_v43, %v4007_v49  ;;  %v653_v51 = vsub.f32 %v648_v17, %v4007_v49  ;;  %v2588_v43 = vmul.f32 %v3999_v38, %v3961_v56 }
0x2be7   :  { %v651_v54 = vmul.f32 1.442695, %v650_v50  ;;  %v654_v6 = vmul.f32 1.442695, %v653_v51 }
0x2be9   :  { %3459 = vpow2.f32 %v651_v54 }
0x2bea   :  { %3461 = vpow2.f32 %v654_v6 }
0x2bed   :  { %v3456_v57 = vpop.eup %3455 }
0x2bee   :  { %v515_v3 = vmul.f32 0.0, %v3456_v57  ;;  %v3458_v14 = vpop.eup %3457 }
0x2bf0   :  { %v516_v55 = vadd.f32 %v3458_v14, %v515_v3 }
0x2bf3   :  { %v3460_v63 = vpop.eup %3459 }
0x2bf4   :  { %v656_v0 = vmul.f32 %v3460_v63, %v516_v55  ;;  %660 = vperm.xlu0 %3349, %v3460_v63   ;;  %v3462_v1 = vpop.eup %3461 }
0x2bf6   :  { %v4015_v40 = vadd.f32 %v3462_v1, %v656_v0 }
0x2bf8   :  { %666 = vperm.xlu0 %3349, %v3462_v1  }
0x2bfc   :  { %3356 = vperm.xlu0 %3349, %v3355_v13  }
0x2c3b   :  { %v2591_v33 = vpop.permute.xlu1 %2590 }
0x2c3c   :  { %v2593_v34 = vmul.f32 %v3999_v38, %v2591_v33 }
0x2c73   :  { %v4017_v16 = vpop.permute.xlu0 %660 }
0x2c77   :  { %v4019_v18 = vpop.permute.xlu0 %666 }
0x2c7b   :  { %v3357_v20 = vpop.permute.xlu0 %3356 }
0x2c7c   :  { %v3359_v21 = vunpack.i.h.bf16 %v3357_v20  ;;  %v3358_v27 = vunpack.i.l.bf16 %v3357_v20  ;;  %v669_v20 = vmul.f32 %v4019_v18, %v3990_v7 }
0x2c7e   :  { %v4022_v28 = vmul.f32 %v3359_v21, %v3743_v19  ;;  %v4025_v31 = vmul.f32 %v3358_v27, %v3719_v52 }
0x2c80   :  { %v922_v32 = vmul.f32 %v4022_v28, %v3985_v22  ;;  %v781_v62 = vmul.f32 %v4025_v31, %v3985_v22 }
0x2c82   :  { %924 = vrot.lane.b32.xlu1 %v922_v32, %s3555_s29  ;;  %783 = vrot.lane.b32.xlu0 %v781_v62, %s3555_s29 }
0x2c86   :  { %2595 = vrot.lane.b32.xlu1 %v2593_v34, %s3555_s29 }
0x2cf4   :  { %v784_v19 = vpop.permute.xlu0 %783  ;;  %v925_v35 = vpop.permute.xlu1 %924 }
0x2cf5   :  { %v786_v52 = vsel %vm377_vm3, %v784_v19, 0.0  ;;  %v927_v29 = vsel %vm377_vm3, %v925_v35, 0.0 }
0x2cf6   :  { %787 = vadd.xlane.f32.xlu0 %v786_v52  ;;  %928 = vadd.xlane.f32.xlu1 %v927_v29  ;;  %v2841_v52 = vsel %vm2605_vm0, 1.0, %v3552_v4 }
0x2cf8   :  { %v2596_v59 = vpop.permute.xlu1 %2595 }
0x2cf9   :  { %v2598_v45 = vadd.f32 %v2596_v59, %v2588_v43 }
0x2cfb   :  { %3463 = vtanh.f32 %v2598_v45 }
0x2d05   :  { %v3464_v17 = vpop.eup %3463 }
0x2d07   :  { %519 = vperm.xlu1 %3360, %v3456_v57  }
0x2d0b   :  { %525 = vperm.xlu1 %3360, %v3458_v14  }
0x2d0c   :  { %1059 = vperm.xlu0 %3349, %v2797_v58  }
0x2d10   :  { %1341 = vperm.xlu0 %3349, %v2805_v36  }
0x2d14   :  { %1482 = vperm.xlu0 %3349, %v2809_v23  }
0x2d18   :  { %1623 = vperm.xlu0 %3349, %v2813_v39  }
0x2d1c   :  { %1764 = vperm.xlu0 %3349, %v2817_v26  }
0x2d20   :  { %1905 = vperm.xlu0 %3349, %v2821_v61  }
0x2d24   :  { %2187 = vperm.xlu0 %3349, %v2829_v47  }
0x2d28   :  { %2469 = vperm.xlu0 %3349, %v2837_v5  }
0x2d2c   :  { %2601 = vrot.lane.b32.xlu0 %v3464_v17, %s3554_s3 }
0x2d83   :  { %v788_v56 = vpop.xlane.xlu0 %787  ;;  %v929_v8 = vpop.xlane.xlu1 %928 }
0x2d84   :  { %v789_v50 = vadd.f32 %v4003_v41, %v788_v56  ;;  %v4061_v54 = vadd.f32 %v4003_v41, %v929_v8 }
0x2d86   :  { %v4058_v51 = vmax.f32 %v4007_v49, %v789_v50 }
0x2d87   :  { %v520_v6 = vpop.permute.xlu1 %519 }
0x2d88   :  { %v791_v57 = vsub.f32 %v4007_v49, %v4058_v51  ;;  %v794_v3 = vsub.f32 %v789_v50, %v4058_v51  ;;  %v4068_v14 = vmax.f32 %v4058_v51, %v4061_v54  ;;  %v522_v10 = vmul.f32 0.0, %v520_v6 }
0x2d8a   :  { %v792_v55 = vmul.f32 1.442695, %v791_v57  ;;  %v795_v63 = vmul.f32 1.442695, %v794_v3  ;;  %v932_v0 = vsub.f32 %v4058_v51, %v4068_v14  ;;  %v935_v1 = vsub.f32 %v4061_v54, %v4068_v14 }
0x2d8b   :  { %v526_v9 = vpop.permute.xlu1 %525  ;;  %v1060_v32 = vpop.permute.xlu0 %1059 }
0x2d8c   :  { %3465 = vpow2.f32 %v792_v55  ;;  %v528_v13 = vmul.f32 %v526_v9, %v3983_v60  ;;  %v2801_v60 = vsel %vm1195_vm15, 1.0, %v3552_v4  ;;  %v4090_v29 = vmul.f32 %v1060_v32, %v3759_v46 }
0x2d8d   :  { %3467 = vpow2.f32 %v795_v63  ;;  %v936_v51 = vmul.f32 1.442695, %v935_v1 }
0x2d8e   :  { %v529_v49 = vadd.f32 %v528_v13, %v522_v10  ;;  %v1063_v36 = vmul.f32 %v4090_v29, %v3985_v22 }
0x2d8f   :  { %v1342_v35 = vpop.permute.xlu0 %1341 }
0x2d90   :  { %v663_v21 = vmul.f32 %v4017_v16, %v529_v49  ;;  %v2825_v16 = vsel %vm2041_vm1, 1.0, %v3552_v4  ;;  %v4095_v23 = vmul.f32 %v1342_v35, %v3817_v53 }
0x2d92   :  { %v670_v27 = vadd.f32 %v669_v20, %v663_v21  ;;  %v1345_v42 = vmul.f32 %v4095_v23, %v3985_v22 }
0x2d93   :  { %v1483_v7 = vpop.permute.xlu0 %1482 }
0x2d96   :  { %v3466_v62 = vpop.eup %3465 }
0x2d97   :  { %v797_v33 = vmul.f32 %v3466_v62, %v4015_v40  ;;  %801 = vperm.xlu1 %3360, %v3466_v62   ;;  %v3468_v34 = vpop.eup %3467  ;;  %v2833_v40 = vsel %vm2323_vm2, 1.0, %v3552_v4  ;;  %v1624_v18 = vpop.permute.xlu0 %1623 }
0x2d99   :  { %v4079_v19 = vadd.f32 %v3468_v34, %v797_v33 }
0x2d9b   :  { %807 = vperm.xlu1 %3360, %v3468_v34   ;;  %v1765_v58 = vpop.permute.xlu0 %1764 }
0x2d9c   :  { %v4101_v39 = vmul.f32 %v1765_v58, %v3892_v12 }
0x2d9e   :  { %v1768_v46 = vmul.f32 %v4101_v39, %v3985_v22 }
0x2d9f   :  { %1200 = vperm.xlu1 %3360, %v2801_v60   ;;  %v1906_v4 = vpop.permute.xlu0 %1905 }
0x2da0   :  { %v4107_v26 = vmul.f32 %v1906_v4, %v3907_v37  ;;  %v4120_v37 = vmul.f32 %v1483_v7, %v3863_v30 }
0x2da2   :  { %v1909_v53 = vmul.f32 %v4107_v26, %v3985_v22  ;;  %v1486_v8 = vmul.f32 %v4120_v37, %v3985_v22 }
0x2da3   :  { %2046 = vperm.xlu1 %3360, %v2825_v16  }
0x2da7   :  { %2328 = vperm.xlu1 %3360, %v2833_v40  }
0x2dab   :  { %2610 = vperm.xlu1 %3360, %v2841_v52  }
0x2daf   :  { %1065 = vrot.lane.b32.xlu1 %v1063_v36, %s3555_s29 }
0x2db3   :  { %1347 = vrot.lane.b32.xlu1 %v1345_v42, %s3555_s29  ;;  %v933_v42 = vmul.f32 1.442695, %v932_v0 }
0x2db5   :  { %3469 = vpow2.f32 %v933_v42 }
0x2db6   :  { %3471 = vpow2.f32 %v936_v51 }
0x2db7   :  { %1770 = vrot.lane.b32.xlu1 %v1768_v46, %s3555_s29 }
0x2dbb   :  { %1911 = vrot.lane.b32.xlu1 %v1909_v53, %s3555_s29 }
0x2e16   :  { %v802_v59 = vpop.permute.xlu1 %801 }
0x2e17   :  { %v804_v43 = vmul.f32 %v802_v59, %v670_v27 }
0x2e1a   :  { %v808_v12 = vpop.permute.xlu1 %807 }
0x2e1b   :  { %v810_v45 = vmul.f32 %v808_v12, %v4025_v31  ;;  %v4128_v31 = vmul.f32 %v1624_v18, %v3877_v48 }
0x2e1d   :  { %v4114_v61 = vadd.f32 %v810_v45, %v804_v43  ;;  %v1627_v30 = vmul.f32 %v4128_v31, %v3985_v22  ;;  %v3470_v45 = vpop.eup %3469 }
0x2e1e   :  { %v1201_v47 = vpop.permute.xlu1 %1200 }
0x2e1f   :  { %v4117_v5 = vmul.f32 %v1201_v47, %v3779_v15  ;;  %v2188_v15 = vpop.permute.xlu0 %2187 }
0x2e20   :  { %v4138_v3 = vmul.f32 %v2188_v15, %v3937_v25 }
0x2e21   :  { %v1204_v17 = vmul.f32 %v4117_v5, %v3985_v22 }
0x2e22   :  { %v2047_v56 = vpop.permute.xlu1 %2046 }
0x2e23   :  { %1206 = vrot.lane.b32.xlu0 %v1204_v17, %s3555_s29  ;;  %v4134_v6 = vmul.f32 %v2047_v56, %v3922_v24  ;;  %v2470_v55 = vpop.permute.xlu0 %2469  ;;  %v2191_v24 = vmul.f32 %v4138_v3, %v3985_v22 }
0x2e24   :  { %v4152_v20 = vmul.f32 %v2470_v55, %v3974_v11 }
0x2e25   :  { %v2050_v48 = vmul.f32 %v4134_v6, %v3985_v22 }
0x2e26   :  { %v2329_v50 = vpop.permute.xlu1 %2328 }
0x2e27   :  { %1488 = vrot.lane.b32.xlu0 %v1486_v8, %s3555_s29  ;;  %v4147_v10 = vmul.f32 %v2329_v50, %v3951_v44  ;;  %v2602_v49 = vpop.permute.xlu0 %2601  ;;  %v2473_v44 = vmul.f32 %v4152_v20, %v3985_v22 }
0x2e28   :  { %v2604_v27 = vmul.f32 %v3999_v38, %v2602_v49 }
0x2e29   :  { %v2332_v21 = vmul.f32 %v4147_v10, %v3985_v22 }
0x2e2a   :  { %v2611_v57 = vpop.permute.xlu1 %2610 }
0x2e2b   :  { %1629 = vrot.lane.b32.xlu0 %v1627_v30, %s3555_s29  ;;  %v4160_v32 = vmul.f32 %v2611_v57, %v2604_v27  ;;  %v3472_v30 = vpop.eup %3471  ;;  %v938_v57 = vmul.f32 %v3470_v45, %v4079_v19 }
0x2e2d   :  { %v2614_v62 = vmul.f32 %v4160_v32, %v3985_v22 }
0x2e2e   :  { %v1066_v63 = vpop.permute.xlu1 %1065 }
0x2e2f   :  { %v1068_v9 = vsel %vm377_vm3, %v1066_v63, 0.0  ;;  %2052 = vrot.lane.b32.xlu0 %v2050_v48, %s3555_s29  ;;  %v939_v48 = vadd.f32 %v3472_v30, %v938_v57 }
0x2e30   :  { %1069 = vadd.xlane.f32.xlu1 %v1068_v9 }
0x2e32   :  { %v1348_v13 = vpop.permute.xlu1 %1347 }
0x2e33   :  { %v1350_v25 = vsel %vm377_vm3, %v1348_v13, 0.0  ;;  %2193 = vrot.lane.b32.xlu0 %v2191_v24, %s3555_s29 }
0x2e34   :  { %1351 = vadd.xlane.f32.xlu1 %v1350_v25 }
0x2e36   :  { %v1771_v11 = vpop.permute.xlu1 %1770 }
0x2e37   :  { %2334 = vrot.lane.b32.xlu0 %v2332_v21, %s3555_s29  ;;  %v1773_v18 = vsel %vm377_vm3, %v1771_v11, 0.0 }
0x2e3a   :  { %v1912_v35 = vpop.permute.xlu1 %1911 }
0x2e3b   :  { %2475 = vrot.lane.b32.xlu0 %v2473_v44, %s3555_s29  ;;  %v1914_v60 = vsel %vm377_vm3, %v1912_v35, 0.0 }
0x2e3f   :  { %2616 = vrot.lane.b32.xlu0 %v2614_v62, %s3555_s29 }
0x2e95   :  { %v1207_v33 = vpop.permute.xlu0 %1206 }
0x2e96   :  { %v1209_v34 = vsel %vm377_vm3, %v1207_v33, 0.0 }
0x2e97   :  { %1210 = vadd.xlane.f32.xlu0 %v1209_v34 }
0x2e99   :  { %v1489_v38 = vpop.permute.xlu0 %1488 }
0x2e9a   :  { %v1491_v7 = vsel %vm377_vm3, %v1489_v38, 0.0 }
0x2e9b   :  { %1492 = vadd.xlane.f32.xlu1 %v1491_v7  ;;  %1915 = vadd.xlane.f32.xlu0 %v1914_v60 }
0x2e9d   :  { %v1630_v16 = vpop.permute.xlu0 %1629 }
0x2e9e   :  { %v1632_v40 = vsel %vm377_vm3, %v1630_v16, 0.0 }
0x2e9f   :  { %1633 = vadd.xlane.f32.xlu1 %v1632_v40 }
0x2ea1   :  { %v2053_v22 = vpop.permute.xlu0 %2052 }
0x2ea2   :  { %v2055_v58 = vsel %vm377_vm3, %v2053_v22, 0.0 }
0x2ea3   :  { %1774 = vadd.xlane.f32.xlu1 %v1773_v18 }
0x2ea5   :  { %v2194_v52 = vpop.permute.xlu0 %2193 }
0x2ea6   :  { %v2196_v36 = vsel %vm377_vm3, %v2194_v52, 0.0 }
0x2ea7   :  { %2056 = vadd.xlane.f32.xlu1 %v2055_v58  ;;  %2197 = vadd.xlane.f32.xlu0 %v2196_v36 }
0x2ea9   :  { %v2335_v4 = vpop.permute.xlu0 %2334 }
0x2eaa   :  { %v2337_v46 = vsel %vm377_vm3, %v2335_v4, 0.0 }
0x2eab   :  { %2338 = vadd.xlane.f32.xlu0 %v2337_v46 }
0x2ead   :  { %v2476_v53 = vpop.permute.xlu0 %2475 }
0x2eae   :  { %v2478_v59 = vsel %vm377_vm3, %v2476_v53, 0.0 }
0x2eaf   :  { %2479 = vadd.xlane.f32.xlu0 %v2478_v59 }
0x2eb1   :  { %v2617_v43 = vpop.permute.xlu0 %2616 }
0x2eb2   :  { %v2619_v12 = vsel %vm377_vm3, %v2617_v43, 0.0 }
0x2eb3   :  { %2620 = vadd.xlane.f32.xlu0 %v2619_v12 }
0x2eb8   :  { %942 = vperm.xlu1 %3360, %v3470_v45  }
0x2ebd   :  { %v1070_v0 = vpop.xlane.xlu1 %1069 }
0x2ebe   :  { %v1071_v47 = vadd.f32 %v4003_v41, %v1070_v0 }
0x2ec0   :  { %v1072_v17 = vmax.f32 %v4068_v14, %v1071_v47 }
0x2ec1   :  { %v1352_v9 = vpop.xlane.xlu1 %1351 }
0x2ec2   :  { %v1073_v56 = vsub.f32 %v4068_v14, %v1072_v17  ;;  %v1076_v8 = vsub.f32 %v1071_v47, %v1072_v17  ;;  %v1353_v13 = vadd.f32 %v4003_v41, %v1352_v9 }
0x2ec4   :  { %v1074_v50 = vmul.f32 1.442695, %v1073_v56  ;;  %v1077_v15 = vmul.f32 1.442695, %v1076_v8 }
0x2ec6   :  { %3473 = vpow2.f32 %v1074_v50 }
0x2ec7   :  { %3475 = vpow2.f32 %v1077_v15 }
0x2ec9   :  { %948 = vperm.xlu0 %3349, %v3472_v30  }
0x2ed0   :  { %v3474_v54 = vpop.eup %3473 }
0x2ed1   :  { %v3476_v1 = vpop.eup %3475  ;;  %v1079_v55 = vmul.f32 %v3474_v54, %v939_v48  ;;  %1083 = vperm.xlu1 %3360, %v3474_v54  }
0x2ed2   :  { %1089 = vperm.xlu0 %3349, %v3476_v1  }
0x2ed3   :  { %v1080_v63 = vadd.f32 %v3476_v1, %v1079_v55 }
0x2f24   :  { %v1211_v24 = vpop.xlane.xlu0 %1210 }
0x2f25   :  { %v1212_v14 = vadd.f32 %v4003_v41, %v1211_v24 }
0x2f27   :  { %v1213_v25 = vmax.f32 %v1072_v17, %v1212_v14 }
0x2f28   :  { %v1493_v49 = vpop.xlane.xlu1 %1492  ;;  %v1916_v52 = vpop.xlane.xlu0 %1915 }
0x2f29   :  { %v1214_v21 = vsub.f32 %v1072_v17, %v1213_v25  ;;  %v1217_v27 = vsub.f32 %v1212_v14, %v1213_v25  ;;  %v1354_v44 = vmax.f32 %v1213_v25, %v1353_v13  ;;  %v1494_v19 = vadd.f32 %v4003_v41, %v1493_v49 }
0x2f2a   :  { %v1917_v59 = vadd.f32 %v4003_v41, %v1916_v52 }
0x2f2b   :  { %v1215_v62 = vmul.f32 1.442695, %v1214_v21  ;;  %v1218_v11 = vmul.f32 1.442695, %v1217_v27  ;;  %v1355_v33 = vsub.f32 %v1213_v25, %v1354_v44  ;;  %v1358_v34 = vsub.f32 %v1353_v13, %v1354_v44 }
0x2f2c   :  { %v1495_v35 = vmax.f32 %v1354_v44, %v1494_v19  ;;  %v1634_v38 = vpop.xlane.xlu1 %1633 }
0x2f2d   :  { %3477 = vpow2.f32 %v1215_v62  ;;  %v1356_v60 = vmul.f32 1.442695, %v1355_v33  ;;  %v1635_v7 = vadd.f32 %v4003_v41, %v1634_v38  ;;  %v1359_v16 = vmul.f32 1.442695, %v1358_v34 }
0x2f2e   :  { %v1496_v40 = vsub.f32 %v1354_v44, %v1495_v35  ;;  %v1499_v22 = vsub.f32 %v1494_v19, %v1495_v35  ;;  %3479 = vpow2.f32 %v1218_v11 }
0x2f2f   :  { %v1636_v18 = vmax.f32 %v1495_v35, %v1635_v7  ;;  %3481 = vpow2.f32 %v1356_v60 }
0x2f30   :  { %v1497_v58 = vmul.f32 1.442695, %v1496_v40  ;;  %v1500_v36 = vmul.f32 1.442695, %v1499_v22  ;;  %v1775_v42 = vpop.xlane.xlu1 %1774  ;;  %3483 = vpow2.f32 %v1359_v16 }
0x2f31   :  { %v1637_v4 = vsub.f32 %v1495_v35, %v1636_v18  ;;  %v1640_v46 = vsub.f32 %v1635_v7, %v1636_v18  ;;  %v1776_v53 = vadd.f32 %v4003_v41, %v1775_v42 }
0x2f32   :  { %3485 = vpow2.f32 %v1500_v36 }
0x2f33   :  { %v1641_v43 = vmul.f32 1.442695, %v1640_v46  ;;  %v1777_v12 = vmax.f32 %v1636_v18, %v1776_v53  ;;  %3487 = vpow2.f32 %v1497_v58  ;;  %v1638_v0 = vmul.f32 1.442695, %v1637_v4 }
0x2f34   :  { %v2198_v45 = vpop.xlane.xlu0 %2197  ;;  %v2057_v51 = vpop.xlane.xlu1 %2056 }
0x2f35   :  { %v1778_v47 = vsub.f32 %v1636_v18, %v1777_v12  ;;  %v1781_v17 = vsub.f32 %v1776_v53, %v1777_v12  ;;  %v1918_v56 = vmax.f32 %v1777_v12, %v1917_v59  ;;  %3489 = vpow2.f32 %v1641_v43 }
0x2f36   :  { %v2058_v8 = vadd.f32 %v4003_v41, %v2057_v51  ;;  %3491 = vpow2.f32 %v1638_v0  ;;  %v2199_v24 = vadd.f32 %v4003_v41, %v2198_v45 }
0x2f37   :  { %v3478_v50 = vpop.eup %3477  ;;  %v1782_v15 = vmul.f32 1.442695, %v1781_v17  ;;  %v1922_v30 = vsub.f32 %v1917_v59, %v1918_v56  ;;  %v1779_v55 = vmul.f32 1.442695, %v1778_v47  ;;  %v1919_v9 = vsub.f32 %v1777_v12, %v1918_v56 }
0x2f38   :  { %v1220_v57 = vmul.f32 %v3478_v50, %v1080_v63  ;;  %v2059_v48 = vmax.f32 %v1918_v56, %v2058_v8  ;;  %v2339_v54 = vpop.xlane.xlu0 %2338  ;;  %1224 = vperm.xlu1 %3360, %v3478_v50   ;;  %v3480_v1 = vpop.eup %3479 }
0x2f39   :  { %3493 = vpow2.f32 %v1782_v15  ;;  %v3482_v25 = vpop.eup %3481  ;;  %v1923_v49 = vmul.f32 1.442695, %v1922_v30  ;;  %v2340_v27 = vadd.f32 %v4003_v41, %v2339_v54  ;;  %v1920_v11 = vmul.f32 1.442695, %v1919_v9 }
0x2f3a   :  { %v1221_v14 = vadd.f32 %v3480_v1, %v1220_v57  ;;  %v2063_v13 = vsub.f32 %v2058_v8, %v2059_v48  ;;  %v2200_v21 = vmax.f32 %v2059_v48, %v2199_v24  ;;  %v3484_v44 = vpop.eup %3483  ;;  %3495 = vpow2.f32 %v1779_v55 }
0x2f3b   :  { %v2060_v33 = vsub.f32 %v1918_v56, %v2059_v48  ;;  %3497 = vpow2.f32 %v1923_v49 }
0x2f3c   :  { %v1361_v19 = vmul.f32 %v3482_v25, %v1221_v14  ;;  %v2480_v63 = vpop.xlane.xlu0 %2479  ;;  %1230 = vperm.xlu1 %3360, %v3480_v1   ;;  %v3486_v62 = vpop.eup %3485  ;;  %v2064_v38 = vmul.f32 1.442695, %v2063_v13  ;;  %v2204_v60 = vsub.f32 %v2199_v24, %v2200_v21  ;;  %v2341_v7 = vmax.f32 %v2200_v21, %v2340_v27 }
0x2f3d   :  { %v3488_v34 = vpop.eup %3487  ;;  %1512 = vperm.xlu0 %3349, %v3486_v62   ;;  %v2481_v16 = vadd.f32 %v4003_v41, %v2480_v63  ;;  %3499 = vpow2.f32 %v1920_v11  ;;  %v2061_v52 = vmul.f32 1.442695, %v2060_v33  ;;  %v2201_v58 = vsub.f32 %v2059_v48, %v2200_v21 }
0x2f3e   :  { %v1362_v35 = vadd.f32 %v3484_v44, %v1361_v19  ;;  %3501 = vpow2.f32 %v2064_v38  ;;  %v2205_v4 = vmul.f32 1.442695, %v2204_v60  ;;  %v2345_v46 = vsub.f32 %v2340_v27, %v2341_v7 }
0x2f3f   :  { %v3490_v40 = vpop.eup %3489  ;;  %v2482_v53 = vmax.f32 %v2341_v7, %v2481_v16  ;;  %3503 = vpow2.f32 %v2061_v52  ;;  %v2202_v45 = vmul.f32 1.442695, %v2201_v58  ;;  %v2342_v51 = vsub.f32 %v2200_v21, %v2341_v7 }
0x2f40   :  { %v1502_v22 = vmul.f32 %v3488_v34, %v1362_v35  ;;  %v2621_v18 = vpop.xlane.xlu0 %2620  ;;  %1365 = vperm.xlu1 %3360, %v3482_v25   ;;  %v3492_v42 = vpop.eup %3491  ;;  %3505 = vpow2.f32 %v2205_v4  ;;  %v2346_v17 = vmul.f32 1.442695, %v2345_v46  ;;  %v2654_v4 = vld [vmem:[%s4238_s6 + $0x10] sm:$0xff] }
0x2f41   :  { %1653 = vperm.xlu0 %3349, %v3490_v40   ;;  %v2622_v59 = vadd.f32 %v4003_v41, %v2621_v18  ;;  %v2483_v56 = vsub.f32 %v2341_v7, %v2482_v53  ;;  %3507 = vpow2.f32 %v2202_v45  ;;  %v2343_v30 = vmul.f32 1.442695, %v2342_v51 }
0x2f42   :  { %v1503_v36 = vadd.f32 %v3486_v62, %v1502_v22  ;;  %v2486_v41 = vsub.f32 %v2481_v16, %v2482_v53  ;;  %3509 = vpow2.f32 %v2346_v17 }
0x2f43   :  { %v3494_v43 = vpop.eup %3493  ;;  %v2623_v8 = vmax.f32 %v2482_v53, %v2622_v59  ;;  %v2484_v54 = vmul.f32 1.442695, %v2483_v56  ;;  %3511 = vpow2.f32 %v2343_v30 }
0x2f44   :  { %v1643_v12 = vmul.f32 %v3492_v42, %v1503_v36  ;;  %1371 = vperm.xlu1 %3360, %v3484_v44   ;;  %v3496_v47 = vpop.eup %3495  ;;  %v2487_v14 = vmul.f32 1.442695, %v2486_v41  ;;  %v2652_v36 = vld [vmem:[%s4238_s6] sm:$0xff] }
0x2f45   :  { %1794 = vperm.xlu0 %3349, %v3494_v43   ;;  %v3498_v15 = vpop.eup %3497  ;;  %v2624_v1 = vsub.f32 %v2482_v53, %v2623_v8  ;;  %3513 = vpow2.f32 %v2484_v54  ;;  %v2627_v49 = vsub.f32 %v2622_v59, %v2623_v8  ;;  %v2655_v53 = vld [vmem:[%s4238_s6 + $0x18] sm:$0xff] }
0x2f46   :  { %v1644_v0 = vadd.f32 %v3490_v40, %v1643_v12  ;;  %3515 = vpow2.f32 %v2487_v14  ;;  %v3336_v59 = vpack.c.bf16 %v2655_v53, %v2654_v4 }
0x2f47   :  { %v3500_v48 = vpop.eup %3499  ;;  %v2625_v25 = vmul.f32 1.442695, %v2624_v1  ;;  %v2628_v63 = vmul.f32 1.442695, %v2627_v49 }
0x2f48   :  { %v1784_v50 = vmul.f32 %v3496_v47, %v1644_v0  ;;  %1506 = vperm.xlu1 %3360, %v3488_v34   ;;  %v3502_v55 = vpop.eup %3501  ;;  %v949_v12 = vpop.permute.xlu0 %948 }
0x2f49   :  { %1935 = vperm.xlu0 %3349, %v3498_v15   ;;  %v3504_v13 = vpop.eup %3503  ;;  %3517 = vpow2.f32 %v2625_v25  ;;  %v951_v45 = vmul.f32 %v949_v12, %v4022_v28 }
0x2f4a   :  { %v1785_v57 = vadd.f32 %v3494_v43, %v1784_v50  ;;  %v3506_v27 = vpop.eup %3505  ;;  %3519 = vpow2.f32 %v2628_v63  ;;  %v943_v43 = vpop.permute.xlu1 %942 }
0x2f4b   :  { %v3508_v19 = vpop.eup %3507  ;;  %v945_v0 = vmul.f32 %v943_v43, %v4114_v61 }
0x2f4c   :  { %v1925_v9 = vmul.f32 %v3500_v48, %v1785_v57  ;;  %1647 = vperm.xlu1 %3360, %v3492_v42   ;;  %v3510_v11 = vpop.eup %3509  ;;  %v2653_v42 = vld [vmem:[%s4238_s6 + $0x8] sm:$0xff] }
0x2f4d   :  { %2076 = vperm.xlu0 %3349, %v3502_v55   ;;  %v3512_v34 = vpop.eup %3511  ;;  %v3333_v46 = vpack.c.bf16 %v2653_v42, %v2652_v36  ;;  %v952_v17 = vadd.f32 %v951_v45, %v945_v0 }
0x2f4e   :  { %v1926_v24 = vadd.f32 %v3498_v15, %v1925_v9 }
0x2f4f   :  { %v3514_v38 = vpop.eup %3513  ;;  %3334 = vmatpush3.bf16.msra.mxu1 %v3333_v46 }
0x2f50   :  { %v2066_v21 = vmul.f32 %v3504_v13, %v1926_v24  ;;  %1788 = vperm.xlu1 %3360, %v3496_v47   ;;  %v3516_v7 = vpop.eup %3515  ;;  %3335 = vmatprep.subr.bf16.mxu1 %v3550_v2  ;;  %v1084_v51 = vpop.permute.xlu1 %1083 }
0x2f51   :  { %2217 = vperm.xlu0 %3349, %v3506_v27   ;;  %v1090_v47 = vpop.permute.xlu0 %1089  ;;  %v1086_v50 = vmul.f32 %v1084_v51, %v952_v17 }
0x2f52   :  { %v2067_v44 = vadd.f32 %v3502_v55, %v2066_v21  ;;  %v1092_v8 = vmul.f32 %v1090_v47, %v4090_v29 }
0x2f53   :  { %v3518_v40 = vpop.eup %3517  ;;  %3337 = vmatpush3.bf16.msra.mxu1 %v3336_v59 }
0x2f54   :  { %v2207_v62 = vmul.f32 %v3508_v19, %v2067_v44  ;;  %1929 = vperm.xlu1 %3360, %v3500_v48   ;;  %v3520_v52 = vpop.eup %3519  ;;  %v1093_v30 = vadd.f32 %v1092_v8, %v1086_v50 }
0x2f55   :  { %2358 = vperm.xlu0 %3349, %v3510_v11  }
0x2f56   :  { %v2208_v33 = vadd.f32 %v3506_v27, %v2207_v62 }
0x2f58   :  { %v2348_v35 = vmul.f32 %v3512_v34, %v2208_v33  ;;  %2070 = vperm.xlu1 %3360, %v3504_v13  }
0x2f59   :  { %2493 = vperm.xlu0 %3349, %v3514_v38  }
0x2f5a   :  { %v2349_v60 = vadd.f32 %v3510_v11, %v2348_v35 }
0x2f5c   :  { %2211 = vperm.xlu1 %3360, %v3508_v19   ;;  %v2489_v16 = vmul.f32 %v3514_v38, %v2349_v60 }
0x2f5d   :  { %2634 = vperm.xlu0 %3349, %v3518_v40  }
0x2f5e   :  { %v2490_v22 = vadd.f32 %v3516_v7, %v2489_v16 }
0x2f60   :  { %2352 = vperm.xlu1 %3360, %v3512_v34   ;;  %v2630_v18 = vmul.f32 %v3518_v40, %v2490_v22 }
0x2f62   :  { %v2631_v58 = vadd.f32 %v3520_v52, %v2630_v18 }
0x2f64   :  { %2647 = vperm.xlu1 %3360, %v2631_v58  }
0x2f68   :  { %2499 = vperm.xlu1 %3360, %v3516_v7  }
0x2f6c   :  { %2640 = vperm.xlu1 %3360, %v3520_v52  }
0x2fb7   :  { %v1225_v56 = vpop.permute.xlu1 %1224 }
0x2fb8   :  { %v1227_v2 = vmul.f32 %v1225_v56, %v1093_v30  ;;  %v2842_v56 = vld [vmem:[%s4239_s7] ss:$0 sm:$0xff] }
0x2fbb   :  { %v1231_v15 = vpop.permute.xlu1 %1230 }
0x2fbc   :  { %v1233_v57 = vmul.f32 %v1231_v15, %v4117_v5  ;;  %v1513_v41 = vpop.permute.xlu0 %1512 }
0x2fbd   :  { %v1515_v13 = vmul.f32 %v1513_v41, %v4120_v37 }
0x2fbe   :  { %v1234_v54 = vadd.f32 %v1233_v57, %v1227_v2 }
0x2fbf   :  { %v1366_v48 = vpop.permute.xlu1 %1365 }
0x2fc0   :  { %v1654_v1 = vpop.permute.xlu0 %1653  ;;  %v1368_v28 = vmul.f32 %v1366_v48, %v1234_v54 }
0x2fc1   :  { %v1656_v21 = vmul.f32 %v1654_v1, %v4128_v31 }
0x2fc3   :  { %v1372_v55 = vpop.permute.xlu1 %1371 }
0x2fc4   :  { %v1374_v9 = vmul.f32 %v1372_v55, %v4095_v23  ;;  %v1795_v24 = vpop.permute.xlu0 %1794 }
0x2fc5   :  { %v1797_v63 = vmul.f32 %v1795_v24, %v4101_v39 }
0x2fc6   :  { %v1375_v61 = vadd.f32 %v1374_v9, %v1368_v28 }
0x2fc7   :  { %v1507_v14 = vpop.permute.xlu1 %1506 }
0x2fc8   :  { %v1509_v29 = vmul.f32 %v1507_v14, %v1375_v61  ;;  %v1936_v27 = vpop.permute.xlu0 %1935 }
0x2fc9   :  { %v1938_v34 = vmul.f32 %v1936_v27, %v4107_v26 }
0x2fca   :  { %v1516_v25 = vadd.f32 %v1515_v13, %v1509_v29 }
0x2fcb   :  { %v1648_v49 = vpop.permute.xlu1 %1647 }
0x2fcc   :  { %v1650_v5 = vmul.f32 %v1648_v49, %v1516_v25  ;;  %v2077_v33 = vpop.permute.xlu0 %2076 }
0x2fcd   :  { %v2079_v60 = vmul.f32 %v2077_v33, %v4134_v6 }
0x2fce   :  { %v1657_v44 = vadd.f32 %v1656_v21, %v1650_v5 }
0x2fcf   :  { %v1789_v19 = vpop.permute.xlu1 %1788 }
0x2fd0   :  { %v1791_v62 = vmul.f32 %v1789_v19, %v1657_v44  ;;  %v2218_v16 = vpop.permute.xlu0 %2217 }
0x2fd1   :  { %v2220_v22 = vmul.f32 %v2218_v16, %v4138_v3 }
0x2fd2   :  { %v1798_v11 = vadd.f32 %v1797_v63, %v1791_v62 }
0x2fd3   :  { %v1930_v23 = vpop.permute.xlu1 %1929 }
0x2fd4   :  { %v1932_v35 = vmul.f32 %v1930_v23, %v1798_v11  ;;  %v2359_v39 = vpop.permute.xlu0 %2358 }
0x2fd5   :  { %v2361_v42 = vmul.f32 %v2359_v39, %v4147_v10 }
0x2fd6   :  { %v1939_v38 = vadd.f32 %v1938_v34, %v1932_v35 }
0x2fd7   :  { %v2071_v37 = vpop.permute.xlu1 %2070 }
0x2fd8   :  { %v2073_v7 = vmul.f32 %v2071_v37, %v1939_v38  ;;  %v2494_v46 = vpop.permute.xlu0 %2493 }
0x2fda   :  { %v2080_v31 = vadd.f32 %v2079_v60, %v2073_v7 }
0x2fdb   :  { %v2212_v40 = vpop.permute.xlu1 %2211 }
0x2fdc   :  { %v2214_v18 = vmul.f32 %v2212_v40, %v2080_v31  ;;  %v2635_v12 = vpop.permute.xlu0 %2634 }
0x2fde   :  { %v2221_v52 = vadd.f32 %v2220_v22, %v2214_v18 }
0x2fdf   :  { %v2353_v58 = vpop.permute.xlu1 %2352 }
0x2fe0   :  { %v2355_v36 = vmul.f32 %v2353_v58, %v2221_v52 }
0x2fe2   :  { %v2362_v26 = vadd.f32 %v2361_v42, %v2355_v36 }
0x2fe3   :  { %v2648_v4 = vpop.permute.xlu1 %2647 }
0x2fe4   :  { %3521 = vrcp.f32 %v2648_v4  ;;  %v2496_v59 = vmul.f32 %v2494_v46, %v2362_v26 }
0x2fe7   :  { %v2500_v53 = vpop.permute.xlu1 %2499 }
0x2fe8   :  { %v2502_v6 = vmul.f32 %v2500_v53, %v4152_v20 }
0x2fea   :  { %v2503_v43 = vadd.f32 %v2502_v6, %v2496_v59 }
0x2feb   :  { %v2641_v45 = vpop.permute.xlu1 %2640 }
0x2fec   :  { %v2637_v51 = vmul.f32 %v2635_v12, %v2503_v43  ;;  %v2643_v3 = vmul.f32 %v2641_v45, %v4160_v32 }
0x2fee   :  { %v3522_v0 = vpop.eup %3521  ;;  %v2644_v47 = vadd.f32 %v2643_v3, %v2637_v51 }
0x2ff0   :  { %v2651_v17 = vmul.f32 %v3522_v0, %v2644_v47 }
0x2ff2   :  { %2664 = vrot.lane.b32.xlu0 %v2651_v17, %s3555_s29 }
0x3064   :  { %v2665_v10 = vpop.permute.xlu0 %2664 }
0x3065   :  { %3202 = vmatmul.mubr.msk.f32.vlgmr.msra.gmra.mrb[22].mxu1 %vm377_vm3, %v2665_v10 }
0x3138   :  { %v2734_v8 = vpop.f32.mrb[22].mxu1 }
0x3139   :  { %v2735_v20 = vadd.f32 %v2842_v56, %v2734_v8  ;;  %v3203_v50 = vpop.f32.mrb[23].mxu1 }
0x313b   :  { %2739 = vst.msk [vmem:[%s4240_s8] sm:$0xff] %vm2738_vm4, %v2735_v20 }
0x313c   :  { %2744 = vsyncpa [#allocation4], 1 }

</bundles_post_ra>
